<compile_context>
chip_gen: v6e
topology: v6e:2x2x1
jax: 0.10.0
libtpu: 0.0.40
codegen_flags: <defaults>
</compile_context>

<pallas_src>
import math
import functools

import jax
import jax.numpy as jnp
from jax.experimental import pallas as pl
from jax.experimental.pallas import tpu as pltpu

# ----------------------------- model config --------------------------------
HIDDEN_DIM = 32       # E
NUM_HEADS = 4         # H
HEAD_DIM = HIDDEN_DIM // NUM_HEADS
LN_EPS = 1e-5


def _layernorm(x, gamma, beta):
    mean = jnp.mean(x, axis=-1, keepdims=True)
    var = jnp.mean((x - mean) ** 2, axis=-1, keepdims=True)
    return (x - mean) * jax.lax.rsqrt(var + LN_EPS) * gamma + beta


# ------------------------------- kernel ------------------------------------
def cross_attn_block_kernel(
    q_ref, kv_ref,                 # (b_blk, Lq, E), (b_blk, Lkv, E)
    w_sq_ref,                      # (4, E, E)  = [wq*scale, wo, w1, w2]
    w_kv_ref,                      # (E, 2E)    = [wk | wv]
    vec_ref,                       # (10, E)    = [bq*scale, bk, bv, bo, g1, be1, b1, b2, g2, be2]
    o_ref,                         # (b_blk, Lq, E)
    *, num_heads, head_dim, b_blk, lq, lkv, e,
):
    f32 = jnp.float32
    nq = b_blk * lq
    nkv = b_blk * lkv

    # Flatten (batch-block, seq) -> rows; major-dim merge only (no lane relayout).
    xq = q_ref[...].reshape(nq, e).astype(f32)       # (Nq, E)
    xkv = kv_ref[...].reshape(nkv, e).astype(f32)    # (Nkv, E)

    wq = w_sq_ref[0]        # (E, E), 1/sqrt(head_dim) already folded in
    wo = w_sq_ref[1]
    w1 = w_sq_ref[2]
    w2 = w_sq_ref[3]
    wkv = w_kv_ref[...]     # (E, 2E)

    bq = vec_ref[0:1, :]    # pre-scaled
    bk = vec_ref[1:2, :]
    bv = vec_ref[2:3, :]
    bo = vec_ref[3:4, :]
    g1 = vec_ref[4:5, :]
    be1 = vec_ref[5:6, :]
    b1 = vec_ref[6:7, :]
    b2 = vec_ref[7:8, :]
    g2 = vec_ref[8:9, :]
    be2 = vec_ref[9:10, :]

    # ---- in-projections: one matmul for Q (scale folded), one fused matmul for K|V ----
    q_proj = jnp.dot(xq, wq, preferred_element_type=f32) + bq      # (Nq, E)
    kv_proj = jnp.dot(xkv, wkv, preferred_element_type=f32)        # (Nkv, 2E)
    k_proj = kv_proj[:, :e] + bk                                   # (Nkv, E)
    v_proj = kv_proj[:, e:] + bv                                   # (Nkv, E)

    # ---- per-head attention (independent chains -> scheduler can interleave heads) ----
    ctx_heads = []
    for h in range(num_heads):
        lo = h * head_dim
        hi = lo + head_dim
        qh = q_proj[:, lo:hi].reshape(b_blk, lq, head_dim)
        kh = k_proj[:, lo:hi].reshape(b_blk, lkv, head_dim)
        vh = v_proj[:, lo:hi].reshape(b_blk, lkv, head_dim)

        s = jnp.einsum('bqd,bkd->bqk', qh, kh, preferred_element_type=f32)
        s = s - jnp.max(s, axis=-1, keepdims=True)
        p = jnp.exp(s)
        p = p / jnp.sum(p, axis=-1, keepdims=True)        # exact softmax divide
        ctx_heads.append(jnp.einsum('bqk,bkd->bqd', p, vh, preferred_element_type=f32))

    # Contiguous (Nq, E) context, then a single full-width output projection.
    ctx = jnp.concatenate(ctx_heads, axis=-1).reshape(nq, e)       # (Nq, E)
    attn = jnp.dot(ctx, wo, preferred_element_type=f32) + bo       # (Nq, E)

    # ---- residual + LN1 ----
    x = _layernorm(xq + attn, g1, be1)

    # ---- feed-forward: Linear -> ReLU -> Linear ----
    h1 = jnp.maximum(jnp.dot(x, w1, preferred_element_type=f32) + b1, 0.0)
    ff = jnp.dot(h1, w2, preferred_element_type=f32) + b2

    # ---- residual + LN2 ----
    y = _layernorm(x + ff, g2, be2)

    o_ref[...] = y.reshape(b_blk, lq, e).astype(o_ref.dtype)


# ------------------------------- wrapper ------------------------------------
def _tensorcores_per_device():
    """2 on v7x (2 TC/chip); 1 on v5e/v6e.  Conservative fallback: 1."""
    try:
        kind = jax.devices()[0].device_kind.lower()
    except Exception:
        return 1
    return 2 if "v7" in kind else 1


def _pick_batch_block(b, lq, lkv, e, num_cores):
    """Largest divisor of b that (a) fits a conservative VMEM budget and (b) leaves at
    least `num_cores` grid steps when the part has >1 TensorCore.  On 1-TC parts this
    collapses to a single grid step (no pipeline overhead); on v7x it keeps 2 core-
    sharded blocks, each as large (MXU row-filling) as possible."""
    # Double-buffered q-in + kv-in + out blocks, f32.
    bytes_per_batch = 2 * (2 * lq + lkv) * e * 4
    vmem_cap = 8 << 20   # well under default scoped VMEM on v5e/v6e/v7x
    divisors = [d for d in range(1, b + 1) if b % d == 0]
    fitting = [d for d in divisors if d * bytes_per_batch <= vmem_cap] or [1]
    if num_cores > 1:
        multi = [d for d in fitting if b // d >= num_cores]
        if multi:
            return max(multi)
    return max(fitting)


def pack_params(params, head_dim):
    scale = 1.0 / math.sqrt(head_dim)
    w_sq = jnp.stack(
        [params["wq"] * scale, params["wo"], params["w1"], params["w2"]], axis=0)  # (4,E,E)
    w_kv = jnp.concatenate([params["wk"], params["wv"]], axis=1)                   # (E,2E)
    vec = jnp.concatenate(
        [params["bq"] * scale, params["bk"], params["bv"], params["bo"],
         params["g1"], params["be1"], params["b1"], params["b2"],
         params["g2"], params["be2"]], axis=0)                                     # (10,E)
    return w_sq, w_kv, vec


def cross_attention_block(query, key_value, params, b_blk=None):
    """query: (B, Lq, E); key_value: (B, Lkv, E); returns (B, Lq, E)."""
    B, Lq, E = query.shape
    _, Lkv, _ = key_value.shape
    if b_blk is None:
        b_blk = _pick_batch_block(B, Lq, Lkv, E, _tensorcores_per_device())
    assert B % b_blk == 0
    grid_b = B // b_blk

    w_sq, w_kv, vec = pack_params(params, HEAD_DIM)

    kernel = functools.partial(
        cross_attn_block_kernel, num_heads=NUM_HEADS, head_dim=HEAD_DIM,
        b_blk=b_blk, lq=Lq, lkv=Lkv, e=E)

    return pl.pallas_call(
        kernel,
        out_shape=jax.ShapeDtypeStruct((B, Lq, E), query.dtype),
        grid_spec=pltpu.PrefetchScalarGridSpec(
            num_scalar_prefetch=0,
            grid=(grid_b,),
            in_specs=[
                pl.BlockSpec((b_blk, Lq, E), lambda b: (b, 0, 0)),
                pl.BlockSpec((b_blk, Lkv, E), lambda b: (b, 0, 0)),
                pl.BlockSpec(w_sq.shape, lambda b: (0, 0, 0)),
                pl.BlockSpec(w_kv.shape, lambda b: (0, 0)),
                pl.BlockSpec(vec.shape, lambda b: (0, 0)),
            ],
            out_specs=pl.BlockSpec((b_blk, Lq, E), lambda b: (b, 0, 0)),
        ),
        compiler_params=pltpu.CompilerParams(
            dimension_semantics=("parallel",)),
    )(query, key_value, w_sq, w_kv, vec)


# --------------------------- params / reference -----------------------------
def init_params(key, hidden_dim):
    """Deterministic parameter init (shapes match nn.MultiheadAttention / Linear / LayerNorm)."""
    ks = jax.random.split(key, 8)
    E = hidden_dim
    s = 1.0 / math.sqrt(E)

    def w(k):
        return (jax.random.uniform(k, (E, E), jnp.float32) * 2.0 - 1.0) * s

    return {
        "wq": w(ks[0]), "wk": w(ks[1]), "wv": w(ks[2]),
        "bq": jnp.zeros((1, E), jnp.float32),
        "bk": jnp.zeros((1, E), jnp.float32),
        "bv": jnp.zeros((1, E), jnp.float32),
        "wo": w(ks[3]),
        "bo": jnp.zeros((1, E), jnp.float32),
        "g1": jnp.ones((1, E), jnp.float32),
        "be1": jnp.zeros((1, E), jnp.float32),
        "w1": w(ks[4]),
        "b1": (jax.random.uniform(ks[5], (1, E), jnp.float32) * 2.0 - 1.0) * s,
        "w2": w(ks[6]),
        "b2": (jax.random.uniform(ks[7], (1, E), jnp.float32) * 2.0 - 1.0) * s,
        "g2": jnp.ones((1, E), jnp.float32),
        "be2": jnp.zeros((1, E), jnp.float32),
    }


def cross_attention_block_ref(query, key_value, params):
    """Pure-JAX reference for correctness checking."""
    scale = 1.0 / math.sqrt(HEAD_DIM)

    def one(q, kv):
        Q = q @ params["wq"] + params["bq"]
        K = kv @ params["wk"] + params["bk"]
        V = kv @ params["wv"] + params["bv"]
        outs = []
        for h in range(NUM_HEADS):
            sl = slice(h * HEAD_DIM, (h + 1) * HEAD_DIM)
            s = (Q[:, sl] * scale) @ K[:, sl].T
            p = jax.nn.softmax(s, axis=-1)
            outs.append(p @ V[:, sl])
        attn = jnp.concatenate(outs, axis=-1) @ params["wo"] + params["bo"]
        x = _layernorm(q + attn, params["g1"], params["be1"])
        ff = jnp.maximum(x @ params["w1"] + params["b1"], 0.0) @ params["w2"] + params["b2"]
        return _layernorm(x + ff, params["g2"], params["be2"])

    return jax.vmap(one)(query, key_value)


if __name__ == "__main__":
    B, Lq, Lkv, E = 4, 8, 8, HIDDEN_DIM

    key = jax.random.PRNGKey(0)
    kq, kkv, kp = jax.random.split(key, 3)
    query = jax.random.normal(kq, (B, Lq, E), jnp.float32)
    key_value = jax.random.normal(kkv, (B, Lkv, E), jnp.float32)
    params = init_params(kp, E)

    out = jax.jit(cross_attention_block)(query, key_value, params)
    out = jax.block_until_ready(out)

    ref = cross_attention_block_ref(query, key_value, params)
    assert out.shape == (B, Lq, E)
    assert bool(jnp.all(jnp.isfinite(out)))
    # Softmax divide is exact now; remaining error is default-precision MXU bf16
    # truncation (shared by kernel and reference, different accumulation order).
    err = float(jnp.max(jnp.abs(out - ref)))
    assert bool(jnp.allclose(out, ref, atol=1e-2, rtol=1e-2)), err
    print("KERNEL_OK")
</pallas_src>

<mosaic_0001>
module attributes {stable_mosaic.version = 11 : i64} {
  func.func @cross_attn_block_kernel(%arg0: i32, %arg1: memref<4x8x32xf32, #tpu.memory_space<vmem>>, %arg2: memref<4x8x32xf32, #tpu.memory_space<vmem>>, %arg3: memref<4x32x32xf32, #tpu.memory_space<vmem>>, %arg4: memref<32x64xf32, #tpu.memory_space<vmem>>, %arg5: memref<10x32xf32, #tpu.memory_space<vmem>>, %arg6: memref<4x8x32xf32, #tpu.memory_space<vmem>>) attributes {dimension_semantics = [#tpu.dimension_semantics<parallel>], iteration_bounds = array<i64: 1>, scalar_prefetch = 0 : i64, scratch_operands = 0 : i64, tpu.core_type = #tpu.core_type<tc>, window_params = [{transform_indices = @transform_0, window_bounds = array<i64: 4, 8, 32>}, {transform_indices = @transform_1, window_bounds = array<i64: 4, 8, 32>}, {pipeline_mode = #tpu.pipeline_mode<synchronous>, transform_indices = @transform_2, window_bounds = array<i64: 4, 32, 32>}, {pipeline_mode = #tpu.pipeline_mode<synchronous>, transform_indices = @transform_3, window_bounds = array<i64: 32, 64>}, {pipeline_mode = #tpu.pipeline_mode<synchronous>, transform_indices = @transform_4, window_bounds = array<i64: 10, 32>}, {transform_indices = @transform_5, window_bounds = array<i64: 4, 8, 32>}]} {
    %c0 = arith.constant 0 : index
    %c0_0 = arith.constant 0 : index
    %c0_1 = arith.constant 0 : index
    %0 = vector.load %arg1[%c0, %c0_0, %c0_1] : memref<4x8x32xf32, #tpu.memory_space<vmem>>, vector<4x8x32xf32>
    %1 = vector.shape_cast %0 : vector<4x8x32xf32> to vector<32x32xf32>
    %c0_2 = arith.constant 0 : index
    %c0_3 = arith.constant 0 : index
    %c0_4 = arith.constant 0 : index
    %2 = vector.load %arg2[%c0_2, %c0_3, %c0_4] : memref<4x8x32xf32, #tpu.memory_space<vmem>>, vector<4x8x32xf32>
    %3 = vector.shape_cast %2 : vector<4x8x32xf32> to vector<32x32xf32>
    %c0_5 = arith.constant 0 : index
    %c0_6 = arith.constant 0 : index
    %c0_7 = arith.constant 0 : index
    %4 = vector.load %arg3[%c0_5, %c0_6, %c0_7] : memref<4x32x32xf32, #tpu.memory_space<vmem>>, vector<1x32x32xf32>
    %5 = vector.shape_cast %4 : vector<1x32x32xf32> to vector<32x32xf32>
    %c1 = arith.constant 1 : index
    %c0_8 = arith.constant 0 : index
    %c0_9 = arith.constant 0 : index
    %6 = vector.load %arg3[%c1, %c0_8, %c0_9] : memref<4x32x32xf32, #tpu.memory_space<vmem>>, vector<1x32x32xf32>
    %7 = vector.shape_cast %6 : vector<1x32x32xf32> to vector<32x32xf32>
    %c2 = arith.constant 2 : index
    %c0_10 = arith.constant 0 : index
    %c0_11 = arith.constant 0 : index
    %8 = vector.load %arg3[%c2, %c0_10, %c0_11] : memref<4x32x32xf32, #tpu.memory_space<vmem>>, vector<1x32x32xf32>
    %9 = vector.shape_cast %8 : vector<1x32x32xf32> to vector<32x32xf32>
    %c3 = arith.constant 3 : index
    %c0_12 = arith.constant 0 : index
    %c0_13 = arith.constant 0 : index
    %10 = vector.load %arg3[%c3, %c0_12, %c0_13] : memref<4x32x32xf32, #tpu.memory_space<vmem>>, vector<1x32x32xf32>
    %11 = vector.shape_cast %10 : vector<1x32x32xf32> to vector<32x32xf32>
    %c0_14 = arith.constant 0 : index
    %c0_15 = arith.constant 0 : index
    %12 = vector.load %arg4[%c0_14, %c0_15] : memref<32x64xf32, #tpu.memory_space<vmem>>, vector<32x64xf32>
    %c0_16 = arith.constant 0 : index
    %c0_17 = arith.constant 0 : index
    %13 = vector.load %arg5[%c0_16, %c0_17] : memref<10x32xf32, #tpu.memory_space<vmem>>, vector<1x32xf32>
    %c1_18 = arith.constant 1 : index
    %c0_19 = arith.constant 0 : index
    %14 = vector.load %arg5[%c1_18, %c0_19] : memref<10x32xf32, #tpu.memory_space<vmem>>, vector<1x32xf32>
    %c2_20 = arith.constant 2 : index
    %c0_21 = arith.constant 0 : index
    %15 = vector.load %arg5[%c2_20, %c0_21] : memref<10x32xf32, #tpu.memory_space<vmem>>, vector<1x32xf32>
    %c3_22 = arith.constant 3 : index
    %c0_23 = arith.constant 0 : index
    %16 = vector.load %arg5[%c3_22, %c0_23] : memref<10x32xf32, #tpu.memory_space<vmem>>, vector<1x32xf32>
    %c4 = arith.constant 4 : index
    %c0_24 = arith.constant 0 : index
    %17 = vector.load %arg5[%c4, %c0_24] : memref<10x32xf32, #tpu.memory_space<vmem>>, vector<1x32xf32>
    %c5 = arith.constant 5 : index
    %c0_25 = arith.constant 0 : index
    %18 = vector.load %arg5[%c5, %c0_25] : memref<10x32xf32, #tpu.memory_space<vmem>>, vector<1x32xf32>
    %c6 = arith.constant 6 : index
    %c0_26 = arith.constant 0 : index
    %19 = vector.load %arg5[%c6, %c0_26] : memref<10x32xf32, #tpu.memory_space<vmem>>, vector<1x32xf32>
    %c7 = arith.constant 7 : index
    %c0_27 = arith.constant 0 : index
    %20 = vector.load %arg5[%c7, %c0_27] : memref<10x32xf32, #tpu.memory_space<vmem>>, vector<1x32xf32>
    %c8 = arith.constant 8 : index
    %c0_28 = arith.constant 0 : index
    %21 = vector.load %arg5[%c8, %c0_28] : memref<10x32xf32, #tpu.memory_space<vmem>>, vector<1x32xf32>
    %c9 = arith.constant 9 : index
    %c0_29 = arith.constant 0 : index
    %22 = vector.load %arg5[%c9, %c0_29] : memref<10x32xf32, #tpu.memory_space<vmem>>, vector<1x32xf32>
    %cst = arith.constant dense<0.000000e+00> : vector<32x32xf32>
    %23 = tpu.matmul %1, %5, %cst {dimension_numbers = #tpu.dot_dimension_numbers<[1], [0], [0], [1], [0, 0, 1, 1], [], []>} : vector<32x32xf32>, vector<32x32xf32>, vector<32x32xf32> -> vector<32x32xf32>
    %24 = vector.broadcast %13 : vector<1x32xf32> to vector<32x32xf32>
    %25 = arith.addf %23, %24 : vector<32x32xf32>
    %cst_30 = arith.constant dense<0.000000e+00> : vector<32x64xf32>
    %26 = tpu.matmul %3, %12, %cst_30 {dimension_numbers = #tpu.dot_dimension_numbers<[1], [0], [0], [1], [0, 0, 1, 1], [], []>} : vector<32x32xf32>, vector<32x64xf32>, vector<32x64xf32> -> vector<32x64xf32>
    %27 = vector.extract_strided_slice %26 {offsets = [0, 0], sizes = [32, 32], strides = [1, 1]} : vector<32x64xf32> to vector<32x32xf32>
    %28 = vector.broadcast %14 : vector<1x32xf32> to vector<32x32xf32>
    %29 = arith.addf %27, %28 : vector<32x32xf32>
    %30 = vector.extract_strided_slice %26 {offsets = [0, 32], sizes = [32, 32], strides = [1, 1]} : vector<32x64xf32> to vector<32x32xf32>
    %31 = vector.broadcast %15 : vector<1x32xf32> to vector<32x32xf32>
    %32 = arith.addf %30, %31 : vector<32x32xf32>
    %33 = vector.extract_strided_slice %25 {offsets = [0, 0], sizes = [32, 8], strides = [1, 1]} : vector<32x32xf32> to vector<32x8xf32>
    %34 = vector.shape_cast %33 : vector<32x8xf32> to vector<4x8x8xf32>
    %35 = vector.extract_strided_slice %29 {offsets = [0, 0], sizes = [32, 8], strides = [1, 1]} : vector<32x32xf32> to vector<32x8xf32>
    %36 = vector.shape_cast %35 : vector<32x8xf32> to vector<4x8x8xf32>
    %37 = vector.extract_strided_slice %32 {offsets = [0, 0], sizes = [32, 8], strides = [1, 1]} : vector<32x32xf32> to vector<32x8xf32>
    %38 = vector.shape_cast %37 : vector<32x8xf32> to vector<4x8x8xf32>
    "tpu.trace_start"() <{level = 10 : i32, message = "bqd,bkd->bqk"}> : () -> ()
    %cst_31 = arith.constant dense<0.000000e+00> : vector<4x8x8xf32>
    %39 = tpu.matmul %34, %36, %cst_31 {dimension_numbers = #tpu.dot_dimension_numbers<[2], [2], [1], [1], [0, 0, 0, 1, 1, 1], [0], [0]>} : vector<4x8x8xf32>, vector<4x8x8xf32>, vector<4x8x8xf32> -> vector<4x8x8xf32>
    "tpu.trace_stop"() : () -> ()
    %cst_32 = arith.constant dense<0xFF800000> : vector<4x8xf32>
    %40 = vector.multi_reduction <maximumf>, %39, %cst_32 [2] : vector<4x8x8xf32> to vector<4x8xf32>
    %41 = vector.shape_cast %40 : vector<4x8xf32> to vector<4x8x1xf32>
    %42 = vector.broadcast %41 : vector<4x8x1xf32> to vector<4x8x8xf32>
    %43 = arith.subf %39, %42 : vector<4x8x8xf32>
    %44 = math.exp %43 : vector<4x8x8xf32>
    %cst_33 = arith.constant dense<0.000000e+00> : vector<4x8xf32>
    %45 = vector.multi_reduction <add>, %44, %cst_33 [2] : vector<4x8x8xf32> to vector<4x8xf32>
    %46 = vector.shape_cast %45 : vector<4x8xf32> to vector<4x8x1xf32>
    %47 = vector.broadcast %46 : vector<4x8x1xf32> to vector<4x8x8xf32>
    %48 = arith.divf %44, %47 : vector<4x8x8xf32>
    "tpu.trace_start"() <{level = 10 : i32, message = "bqk,bkd->bqd"}> : () -> ()
    %cst_34 = arith.constant dense<0.000000e+00> : vector<4x8x8xf32>
    %49 = tpu.matmul %48, %38, %cst_34 {dimension_numbers = #tpu.dot_dimension_numbers<[2], [1], [1], [2], [0, 0, 0, 1, 1, 2], [0], [0]>} : vector<4x8x8xf32>, vector<4x8x8xf32>, vector<4x8x8xf32> -> vector<4x8x8xf32>
    "tpu.trace_stop"() : () -> ()
    %50 = vector.extract_strided_slice %25 {offsets = [0, 8], sizes = [32, 8], strides = [1, 1]} : vector<32x32xf32> to vector<32x8xf32>
    %51 = vector.shape_cast %50 : vector<32x8xf32> to vector<4x8x8xf32>
    %52 = vector.extract_strided_slice %29 {offsets = [0, 8], sizes = [32, 8], strides = [1, 1]} : vector<32x32xf32> to vector<32x8xf32>
    %53 = vector.shape_cast %52 : vector<32x8xf32> to vector<4x8x8xf32>
    %54 = vector.extract_strided_slice %32 {offsets = [0, 8], sizes = [32, 8], strides = [1, 1]} : vector<32x32xf32> to vector<32x8xf32>
    %55 = vector.shape_cast %54 : vector<32x8xf32> to vector<4x8x8xf32>
    "tpu.trace_start"() <{level = 10 : i32, message = "bqd,bkd->bqk"}> : () -> ()
    %cst_35 = arith.constant dense<0.000000e+00> : vector<4x8x8xf32>
    %56 = tpu.matmul %51, %53, %cst_35 {dimension_numbers = #tpu.dot_dimension_numbers<[2], [2], [1], [1], [0, 0, 0, 1, 1, 1], [0], [0]>} : vector<4x8x8xf32>, vector<4x8x8xf32>, vector<4x8x8xf32> -> vector<4x8x8xf32>
    "tpu.trace_stop"() : () -> ()
    %cst_36 = arith.constant dense<0xFF800000> : vector<4x8xf32>
    %57 = vector.multi_reduction <maximumf>, %56, %cst_36 [2] : vector<4x8x8xf32> to vector<4x8xf32>
    %58 = vector.shape_cast %57 : vector<4x8xf32> to vector<4x8x1xf32>
    %59 = vector.broadcast %58 : vector<4x8x1xf32> to vector<4x8x8xf32>
    %60 = arith.subf %56, %59 : vector<4x8x8xf32>
    %61 = math.exp %60 : vector<4x8x8xf32>
    %cst_37 = arith.constant dense<0.000000e+00> : vector<4x8xf32>
    %62 = vector.multi_reduction <add>, %61, %cst_37 [2] : vector<4x8x8xf32> to vector<4x8xf32>
    %63 = vector.shape_cast %62 : vector<4x8xf32> to vector<4x8x1xf32>
    %64 = vector.broadcast %63 : vector<4x8x1xf32> to vector<4x8x8xf32>
    %65 = arith.divf %61, %64 : vector<4x8x8xf32>
    "tpu.trace_start"() <{level = 10 : i32, message = "bqk,bkd->bqd"}> : () -> ()
    %cst_38 = arith.constant dense<0.000000e+00> : vector<4x8x8xf32>
    %66 = tpu.matmul %65, %55, %cst_38 {dimension_numbers = #tpu.dot_dimension_numbers<[2], [1], [1], [2], [0, 0, 0, 1, 1, 2], [0], [0]>} : vector<4x8x8xf32>, vector<4x8x8xf32>, vector<4x8x8xf32> -> vector<4x8x8xf32>
    "tpu.trace_stop"() : () -> ()
    %67 = vector.extract_strided_slice %25 {offsets = [0, 16], sizes = [32, 8], strides = [1, 1]} : vector<32x32xf32> to vector<32x8xf32>
    %68 = vector.shape_cast %67 : vector<32x8xf32> to vector<4x8x8xf32>
    %69 = vector.extract_strided_slice %29 {offsets = [0, 16], sizes = [32, 8], strides = [1, 1]} : vector<32x32xf32> to vector<32x8xf32>
    %70 = vector.shape_cast %69 : vector<32x8xf32> to vector<4x8x8xf32>
    %71 = vector.extract_strided_slice %32 {offsets = [0, 16], sizes = [32, 8], strides = [1, 1]} : vector<32x32xf32> to vector<32x8xf32>
    %72 = vector.shape_cast %71 : vector<32x8xf32> to vector<4x8x8xf32>
    "tpu.trace_start"() <{level = 10 : i32, message = "bqd,bkd->bqk"}> : () -> ()
    %cst_39 = arith.constant dense<0.000000e+00> : vector<4x8x8xf32>
    %73 = tpu.matmul %68, %70, %cst_39 {dimension_numbers = #tpu.dot_dimension_numbers<[2], [2], [1], [1], [0, 0, 0, 1, 1, 1], [0], [0]>} : vector<4x8x8xf32>, vector<4x8x8xf32>, vector<4x8x8xf32> -> vector<4x8x8xf32>
    "tpu.trace_stop"() : () -> ()
    %cst_40 = arith.constant dense<0xFF800000> : vector<4x8xf32>
    %74 = vector.multi_reduction <maximumf>, %73, %cst_40 [2] : vector<4x8x8xf32> to vector<4x8xf32>
    %75 = vector.shape_cast %74 : vector<4x8xf32> to vector<4x8x1xf32>
    %76 = vector.broadcast %75 : vector<4x8x1xf32> to vector<4x8x8xf32>
    %77 = arith.subf %73, %76 : vector<4x8x8xf32>
    %78 = math.exp %77 : vector<4x8x8xf32>
    %cst_41 = arith.constant dense<0.000000e+00> : vector<4x8xf32>
    %79 = vector.multi_reduction <add>, %78, %cst_41 [2] : vector<4x8x8xf32> to vector<4x8xf32>
    %80 = vector.shape_cast %79 : vector<4x8xf32> to vector<4x8x1xf32>
    %81 = vector.broadcast %80 : vector<4x8x1xf32> to vector<4x8x8xf32>
    %82 = arith.divf %78, %81 : vector<4x8x8xf32>
    "tpu.trace_start"() <{level = 10 : i32, message = "bqk,bkd->bqd"}> : () -> ()
    %cst_42 = arith.constant dense<0.000000e+00> : vector<4x8x8xf32>
    %83 = tpu.matmul %82, %72, %cst_42 {dimension_numbers = #tpu.dot_dimension_numbers<[2], [1], [1], [2], [0, 0, 0, 1, 1, 2], [0], [0]>} : vector<4x8x8xf32>, vector<4x8x8xf32>, vector<4x8x8xf32> -> vector<4x8x8xf32>
    "tpu.trace_stop"() : () -> ()
    %84 = vector.extract_strided_slice %25 {offsets = [0, 24], sizes = [32, 8], strides = [1, 1]} : vector<32x32xf32> to vector<32x8xf32>
    %85 = vector.shape_cast %84 : vector<32x8xf32> to vector<4x8x8xf32>
    %86 = vector.extract_strided_slice %29 {offsets = [0, 24], sizes = [32, 8], strides = [1, 1]} : vector<32x32xf32> to vector<32x8xf32>
    %87 = vector.shape_cast %86 : vector<32x8xf32> to vector<4x8x8xf32>
    %88 = vector.extract_strided_slice %32 {offsets = [0, 24], sizes = [32, 8], strides = [1, 1]} : vector<32x32xf32> to vector<32x8xf32>
    %89 = vector.shape_cast %88 : vector<32x8xf32> to vector<4x8x8xf32>
    "tpu.trace_start"() <{level = 10 : i32, message = "bqd,bkd->bqk"}> : () -> ()
    %cst_43 = arith.constant dense<0.000000e+00> : vector<4x8x8xf32>
    %90 = tpu.matmul %85, %87, %cst_43 {dimension_numbers = #tpu.dot_dimension_numbers<[2], [2], [1], [1], [0, 0, 0, 1, 1, 1], [0], [0]>} : vector<4x8x8xf32>, vector<4x8x8xf32>, vector<4x8x8xf32> -> vector<4x8x8xf32>
    "tpu.trace_stop"() : () -> ()
    %cst_44 = arith.constant dense<0xFF800000> : vector<4x8xf32>
    %91 = vector.multi_reduction <maximumf>, %90, %cst_44 [2] : vector<4x8x8xf32> to vector<4x8xf32>
    %92 = vector.shape_cast %91 : vector<4x8xf32> to vector<4x8x1xf32>
    %93 = vector.broadcast %92 : vector<4x8x1xf32> to vector<4x8x8xf32>
    %94 = arith.subf %90, %93 : vector<4x8x8xf32>
    %95 = math.exp %94 : vector<4x8x8xf32>
    %cst_45 = arith.constant dense<0.000000e+00> : vector<4x8xf32>
    %96 = vector.multi_reduction <add>, %95, %cst_45 [2] : vector<4x8x8xf32> to vector<4x8xf32>
    %97 = vector.shape_cast %96 : vector<4x8xf32> to vector<4x8x1xf32>
    %98 = vector.broadcast %97 : vector<4x8x1xf32> to vector<4x8x8xf32>
    %99 = arith.divf %95, %98 : vector<4x8x8xf32>
    "tpu.trace_start"() <{level = 10 : i32, message = "bqk,bkd->bqd"}> : () -> ()
    %cst_46 = arith.constant dense<0.000000e+00> : vector<4x8x8xf32>
    %100 = tpu.matmul %99, %89, %cst_46 {dimension_numbers = #tpu.dot_dimension_numbers<[2], [1], [1], [2], [0, 0, 0, 1, 1, 2], [0], [0]>} : vector<4x8x8xf32>, vector<4x8x8xf32>, vector<4x8x8xf32> -> vector<4x8x8xf32>
    "tpu.trace_stop"() : () -> ()
    %101 = tpu.concatenate %49, %66, %83, %100 in 2 : vector<4x8x8xf32>, vector<4x8x8xf32>, vector<4x8x8xf32>, vector<4x8x8xf32> -> vector<4x8x32xf32>
    %102 = vector.shape_cast %101 : vector<4x8x32xf32> to vector<32x32xf32>
    %cst_47 = arith.constant dense<0.000000e+00> : vector<32x32xf32>
    %103 = tpu.matmul %102, %7, %cst_47 {dimension_numbers = #tpu.dot_dimension_numbers<[1], [0], [0], [1], [0, 0, 1, 1], [], []>} : vector<32x32xf32>, vector<32x32xf32>, vector<32x32xf32> -> vector<32x32xf32>
    %104 = vector.broadcast %16 : vector<1x32xf32> to vector<32x32xf32>
    %105 = arith.addf %103, %104 : vector<32x32xf32>
    %106 = arith.addf %1, %105 : vector<32x32xf32>
    %cst_48 = arith.constant dense<0.000000e+00> : vector<32xf32>
    %107 = vector.multi_reduction <add>, %106, %cst_48 [1] : vector<32x32xf32> to vector<32xf32>
    %108 = vector.shape_cast %107 : vector<32xf32> to vector<32x1xf32>
    %cst_49 = arith.constant 3.200000e+01 : f32
    %109 = vector.broadcast %cst_49 : f32 to vector<32x1xf32>
    %110 = arith.divf %108, %109 : vector<32x1xf32>
    %111 = vector.broadcast %110 : vector<32x1xf32> to vector<32x32xf32>
    %112 = arith.subf %106, %111 : vector<32x32xf32>
    %113 = arith.mulf %112, %112 : vector<32x32xf32>
    %cst_50 = arith.constant dense<0.000000e+00> : vector<32xf32>
    %114 = vector.multi_reduction <add>, %113, %cst_50 [1] : vector<32x32xf32> to vector<32xf32>
    %115 = vector.shape_cast %114 : vector<32xf32> to vector<32x1xf32>
    %cst_51 = arith.constant 3.200000e+01 : f32
    %116 = vector.broadcast %cst_51 : f32 to vector<32x1xf32>
    %117 = arith.divf %115, %116 : vector<32x1xf32>
    %118 = vector.broadcast %110 : vector<32x1xf32> to vector<32x32xf32>
    %119 = arith.subf %106, %118 : vector<32x32xf32>
    %cst_52 = arith.constant 9.99999974E-6 : f32
    %120 = vector.broadcast %cst_52 : f32 to vector<32x1xf32>
    %121 = arith.addf %117, %120 : vector<32x1xf32>
    %122 = math.rsqrt %121 : vector<32x1xf32>
    %123 = vector.broadcast %122 : vector<32x1xf32> to vector<32x32xf32>
    %124 = arith.mulf %119, %123 : vector<32x32xf32>
    %125 = vector.broadcast %17 : vector<1x32xf32> to vector<32x32xf32>
    %126 = arith.mulf %124, %125 : vector<32x32xf32>
    %127 = vector.broadcast %18 : vector<1x32xf32> to vector<32x32xf32>
    %128 = arith.addf %126, %127 : vector<32x32xf32>
    %cst_53 = arith.constant dense<0.000000e+00> : vector<32x32xf32>
    %129 = tpu.matmul %128, %9, %cst_53 {dimension_numbers = #tpu.dot_dimension_numbers<[1], [0], [0], [1], [0, 0, 1, 1], [], []>} : vector<32x32xf32>, vector<32x32xf32>, vector<32x32xf32> -> vector<32x32xf32>
    %130 = vector.broadcast %19 : vector<1x32xf32> to vector<32x32xf32>
    %131 = arith.addf %129, %130 : vector<32x32xf32>
    %cst_54 = arith.constant 0.000000e+00 : f32
    %132 = vector.broadcast %cst_54 : f32 to vector<32x32xf32>
    %133 = arith.maximumf %131, %132 : vector<32x32xf32>
    %cst_55 = arith.constant dense<0.000000e+00> : vector<32x32xf32>
    %134 = tpu.matmul %133, %11, %cst_55 {dimension_numbers = #tpu.dot_dimension_numbers<[1], [0], [0], [1], [0, 0, 1, 1], [], []>} : vector<32x32xf32>, vector<32x32xf32>, vector<32x32xf32> -> vector<32x32xf32>
    %135 = vector.broadcast %20 : vector<1x32xf32> to vector<32x32xf32>
    %136 = arith.addf %134, %135 : vector<32x32xf32>
    %137 = arith.addf %128, %136 : vector<32x32xf32>
    %cst_56 = arith.constant dense<0.000000e+00> : vector<32xf32>
    %138 = vector.multi_reduction <add>, %137, %cst_56 [1] : vector<32x32xf32> to vector<32xf32>
    %139 = vector.shape_cast %138 : vector<32xf32> to vector<32x1xf32>
    %cst_57 = arith.constant 3.200000e+01 : f32
    %140 = vector.broadcast %cst_57 : f32 to vector<32x1xf32>
    %141 = arith.divf %139, %140 : vector<32x1xf32>
    %142 = vector.broadcast %141 : vector<32x1xf32> to vector<32x32xf32>
    %143 = arith.subf %137, %142 : vector<32x32xf32>
    %144 = arith.mulf %143, %143 : vector<32x32xf32>
    %cst_58 = arith.constant dense<0.000000e+00> : vector<32xf32>
    %145 = vector.multi_reduction <add>, %144, %cst_58 [1] : vector<32x32xf32> to vector<32xf32>
    %146 = vector.shape_cast %145 : vector<32xf32> to vector<32x1xf32>
    %cst_59 = arith.constant 3.200000e+01 : f32
    %147 = vector.broadcast %cst_59 : f32 to vector<32x1xf32>
    %148 = arith.divf %146, %147 : vector<32x1xf32>
    %149 = vector.broadcast %141 : vector<32x1xf32> to vector<32x32xf32>
    %150 = arith.subf %137, %149 : vector<32x32xf32>
    %cst_60 = arith.constant 9.99999974E-6 : f32
    %151 = vector.broadcast %cst_60 : f32 to vector<32x1xf32>
    %152 = arith.addf %148, %151 : vector<32x1xf32>
    %153 = math.rsqrt %152 : vector<32x1xf32>
    %154 = vector.broadcast %153 : vector<32x1xf32> to vector<32x32xf32>
    %155 = arith.mulf %150, %154 : vector<32x32xf32>
    %156 = vector.broadcast %21 : vector<1x32xf32> to vector<32x32xf32>
    %157 = arith.mulf %155, %156 : vector<32x32xf32>
    %158 = vector.broadcast %22 : vector<1x32xf32> to vector<32x32xf32>
    %159 = arith.addf %157, %158 : vector<32x32xf32>
    %160 = vector.shape_cast %159 : vector<32x32xf32> to vector<4x8x32xf32>
    %c0_61 = arith.constant 0 : index
    %c0_62 = arith.constant 0 : index
    %c0_63 = arith.constant 0 : index
    %161 = vector.load %arg6[%c0_61, %c0_62, %c0_63] : memref<4x8x32xf32, #tpu.memory_space<vmem>>, vector<4x8x32xf32>
    tpu.vector_store %arg6[%c0_61, %c0_62, %c0_63], %160 {strides = array<i32>} : memref<4x8x32xf32, #tpu.memory_space<vmem>>, vector<4x8x32xf32>,
    return
  }
  func.func @transform_0(%arg0: i32) -> (i32, i32, i32) {
    %c0_i32 = arith.constant 0 : i32
    %c0_i32_0 = arith.constant 0 : i32
    %c0_i32_1 = arith.constant 0 : i32
    return %arg0, %c0_i32, %c0_i32_0 : i32, i32, i32
  }
  func.func @transform_1(%arg0: i32) -> (i32, i32, i32) {
    %c0_i32 = arith.constant 0 : i32
    %c0_i32_0 = arith.constant 0 : i32
    %c0_i32_1 = arith.constant 0 : i32
    return %arg0, %c0_i32, %c0_i32_0 : i32, i32, i32
  }
  func.func @transform_2(%arg0: i32) -> (i32, i32, i32) {
    %c0_i32 = arith.constant 0 : i32
    %c0_i32_0 = arith.constant 0 : i32
    %c0_i32_1 = arith.constant 0 : i32
    %c0_i32_2 = arith.constant 0 : i32
    return %c0_i32, %c0_i32_0, %c0_i32_1 : i32, i32, i32
  }
  func.func @transform_3(%arg0: i32) -> (i32, i32) {
    %c0_i32 = arith.constant 0 : i32
    %c0_i32_0 = arith.constant 0 : i32
    %c0_i32_1 = arith.constant 0 : i32
    return %c0_i32, %c0_i32_0 : i32, i32
  }
  func.func @transform_4(%arg0: i32) -> (i32, i32) {
    %c0_i32 = arith.constant 0 : i32
    %c0_i32_0 = arith.constant 0 : i32
    %c0_i32_1 = arith.constant 0 : i32
    return %c0_i32, %c0_i32_0 : i32, i32
  }
  func.func @transform_5(%arg0: i32) -> (i32, i32, i32) {
    %c0_i32 = arith.constant 0 : i32
    %c0_i32_0 = arith.constant 0 : i32
    %c0_i32_1 = arith.constant 0 : i32
    return %arg0, %c0_i32, %c0_i32_0 : i32, i32, i32
  }
}

</mosaic_0001>

<bundles_post_ra>
// kernel: cross_attention_block.1
= control target key start
LH: loop header
LB: loop body
LE: loop exit
PB: predicated region body
PF: predicated region fallthrough
CT: control target
= control target key end

     0   :  { %vm66_vm0 = vcmask 261120   ;;  %s4531_s0 = inlined_call_operand.vmem [shape: f32[4,8,32], index: 0, kind: input, shape index: {}]   ;;  %s4532_s1 = inlined_call_operand.vmem [shape: f32[4,8,32], index: 1, kind: input, shape index: {}]   ;;  %s4533_s2 = inlined_call_operand.vmem [shape: f32[4,32,32], index: 2, kind: input, shape index: {}]   ;;  %s4534_s3 = inlined_call_operand.vmem [shape: f32[32,64], index: 3, kind: input, shape index: {}]   ;;  %s4535_s4 = inlined_call_operand.vmem [shape: f32[10,32], index: 4, kind: input, shape index: {}]   ;;  %s4536_s5 = inlined_call_operand.hbm [shape: f32[4,8,32], index: 5, kind: output, shape index: {}]  }
   0x1   :  { %v51_v0 = vld [vmem:[%s4534_s3 + $0x18] sm:$0xff]  ;;  %v50_v1 = vld [vmem:[%s4534_s3 + $0x10] sm:$0xff]  ;;  %v49_v4 = vld [vmem:[%s4534_s3 + $0x8] sm:$0xff] }
   0x2   :  { %v32_v2 = vld [vmem:[%s4533_s2 + $0x18] sm:$0xff]  ;;  %3660 = vmatprep.subr.mxu1 %v51_v0  ;;  %v31_v3 = vld [vmem:[%s4533_s2 + $0x10] sm:$0xff]  ;;  %v30_v5 = vld [vmem:[%s4533_s2 + $0x8] sm:$0xff] }
   0x3   :  { %3646 = vmatprep.subr.mxu0 %v32_v2  ;;  %3661 = vmatpush3.msra.mxu1 %v51_v0  ;;  %v25_v6 = vld [vmem:[%s4532_s1] sm:$0xff] }
   0x4   :  { %3647 = vmatpush3.msra.mxu0 %v32_v2  ;;  %3662 = vmatprep.subr.mxu1 %v50_v1  ;;  %v48_v7 = vld [vmem:[%s4534_s3] sm:$0xff] }
   0x5   :  { %3648 = vmatprep.subr.mxu0 %v31_v3  ;;  %3663 = vmatpush3.msra.mxu1 %v50_v1  ;;  %v29_v8 = vld [vmem:[%s4533_s2] sm:$0xff] }
   0x6   :  { %3649 = vmatpush3.msra.mxu0 %v31_v3  ;;  %3664 = vmatprep.subr.mxu1 %v49_v4 }
   0x7   :  { %3650 = vmatprep.subr.mxu0 %v30_v5 }
   0x8   :  { %10 = vsyncpa [#allocation3], 0  ;;  %3665 = vmatpush3.msra.mxu1 %v49_v4  ;;  %3668 = vmatprep.mubr.msk.f32.mxu1 %vm66_vm0, %v25_v6  ;;  %v26_v9 = vld [vmem:[%s4532_s1 + $0x8] sm:$0xff]  ;;  %v21_v10 = vld [vmem:[%s4531_s0] sm:$0xff]  ;;  %v3997_v16 = vmov 0.0   ;;  %vm3998_vm1 = vmmov 0  }
   0x9   :  { %3666 = vmatprep.subr.mxu1 %v48_v7  ;;  %3651 = vmatpush3.msra.mxu0 %v30_v5  ;;  %v27_v11 = vld [vmem:[%s4532_s1 + $0x10] sm:$0xff]  ;;  %v22_v12 = vld [vmem:[%s4531_s0 + $0x8] sm:$0xff]  ;;  %v28_v14 = vld [vmem:[%s4532_s1 + $0x18] sm:$0xff]  ;;  %vm281_vm2 = vcmask 64512   ;;  %s3999_s29 = smov 32   ;;  %s4000_s30 = smov 96  }
   0xa   :  { %3667 = vmatpush3.msra.mxu1 %v48_v7  ;;  %3652 = vmatprep.subr.mxu0 %v29_v8  ;;  %v23_v13 = vld [vmem:[%s4531_s0 + $0x10] sm:$0xff]  ;;  %v24_v15 = vld [vmem:[%s4531_s0 + $0x18] sm:$0xff]  ;;  %v3473_v18 = vld [vmem:[%s4535_s4 + $0x1] ss:$0 sm:$0xff]  ;;  %s4001_s6 = smov 120   ;;  %s4002_s7 = smov 88  }
   0xb   :  { %3669 = vmatmul.mubr.msk.f32.vlgmr.msra.gmra.mxu1 %vm66_vm0, %v26_v9  ;;  %3653 = vmatpush3.msra.mxu0 %v29_v8  ;;  %v3464_v22 = vld [vmem:[%s4535_s4] ss:$0 sm:$0xff]  ;;  %v3474_v47 = vld [vmem:[%s4535_s4 + $0x2] ss:$0 sm:$0xff]  ;;  %s4003_s8 = smov 112   ;;  %s4004_s9 = smov 80  }
   0xc   :  { %3654 = vmatprep.mubr.msk.f32.mxu0 %vm66_vm0, %v21_v10  ;;  %3671 = vmatprep.mubr.msk.f32.mxu1 %vm66_vm0, %v27_v11  ;;  %s4005_s10 = smov 104   ;;  %s4006_s11 = smov 72   ;;  %vm2970_vm3 = vcmask 130048   ;;  %vm2975_vm4 = vcmask 195584  }
   0xd   :  { %3655 = vmatmul.mubr.msk.f32.vlgmr.msra.gmra.mxu0 %vm66_vm0, %v22_v12  ;;  %3674 = vmatprep.subr.mxu1 %v3997_v16  ;;  %s4007_s12 = smov 8   ;;  %s4008_s13 = smov 16  }
   0xe   :  { %3657 = vmatprep.mubr.msk.f32.mxu0 %vm66_vm0, %v23_v13  ;;  %3684 = vmatprep.subr.mxu0 %v3997_v16  ;;  %s4009_s21 = smov 24  }
   0xf   :  { %3672 = vmatmul.mubr.msk.f32.gmra.mxu1 %vm66_vm0, %v28_v14 }
  0x10   :  { %3676 = vmatprep.mubr.msk.f32.mxu1 %vm3998_vm1, %v3997_v16 }
  0x11   :  { %3658 = vmatmul.mubr.msk.f32.gmra.mxu0 %vm66_vm0, %v24_v15 }
  0x12   :  { %3686 = vmatprep.mubr.msk.f32.mxu0 %vm3998_vm1, %v3997_v16 }
  0xcb   :  { %v3670_v17 = vpop.f32.mrf.mxu1 }
  0xcc   :  { %v4117_v28 = vadd.f32 %v3670_v17, %v3473_v18 }
  0xcd   :  { %v242_v19 = vpop.f32.mrf.mxu1  ;;  %v3656_v20 = vpop.f32.mrf.mxu0 }
  0xce   :  { %v4107_v21 = vadd.f32 %v3473_v18, %v242_v19  ;;  %v4131_v33 = vadd.f32 %v3656_v20, %v3464_v22 }
  0xcf   :  { %v3673_v23 = vpop.f32.mrf.mxu1  ;;  %v145_v24 = vpop.f32.mrf.mxu0 }
  0xd0   :  { %3675 = vmatpush3.xpose.msk.msra.mxu1 %vm281_vm2, %v4107_v21  ;;  %v4114_v25 = vadd.f32 %v3464_v22, %v145_v24  ;;  %v4123_v31 = vadd.f32 %v3673_v23, %v3473_v18 }
  0xd1   :  { %v252_v26 = vpop.f32.mrf.mxu1  ;;  %v3659_v27 = vpop.f32.mrf.mxu0  ;;  %3679 = vmatprep.subr.mxu1 %v3997_v16 }
  0xd2   :  { %v4119_v29 = vadd.f32 %v3473_v18, %v252_v26  ;;  %v4137_v34 = vadd.f32 %v3659_v27, %v3464_v22 }
  0xd3   :  { %3677 = vmatmul.mubr.msk.f32.vlgmr.msra.gmra.mxu1 %vm281_vm2, %v4114_v25  ;;  %v155_v30 = vpop.f32.mrf.mxu0 }
  0xd4   :  { %v4125_v32 = vadd.f32 %v3464_v22, %v155_v30  ;;  %3680 = vmatpush3.xpose.msk.msra.mxu1 %vm281_vm2, %v4117_v28  ;;  %3685 = vmatpush3.xpose.msk.msra.mxu0 %vm281_vm2, %v4119_v29 }
  0xd5   :  { %3681 = vmatprep.mubr.msk.f32.mxu1 %vm3998_vm1, %v3997_v16  ;;  %3689 = vmatprep.subr.mxu1 %v3997_v16 }
  0xd6   :  { %3694 = vmatprep.subr.mxu0 %v3997_v16 }
  0xd7   :  { %3682 = vmatmul.mubr.msk.f32.vlgmr.msra.gmra.mxu1 %vm281_vm2, %v4131_v33  ;;  %3687 = vmatmul.mubr.msk.f32.vlgmr.msra.gmra.mxu0 %vm281_vm2, %v4125_v32 }
  0xd8   :  { %3690 = vmatpush3.xpose.msk.msra.mxu1 %vm281_vm2, %v4123_v31  ;;  %3691 = vmatprep.mubr.msk.f32.mxu1 %vm3998_vm1, %v3997_v16 }
  0xd9   :  { %3699 = vmatprep.subr.mxu1 %v3997_v16  ;;  %3696 = vmatprep.mubr.msk.f32.mxu0 %vm3998_vm1, %v3997_v16 }
  0xdb   :  { %3692 = vmatmul.mubr.msk.f32.vlgmr.msra.gmra.mxu1 %vm281_vm2, %v4137_v34 }
  0xdc   :  { %3701 = vmatprep.mubr.msk.f32.mxu1 %vm3998_vm1, %v3997_v16 }
 0x193   :  { %v354_v35 = vpop.f32.mrf.mxu1 }
 0x194   :  { %v586_v36 = vsel %vm281_vm2, %v354_v35, -inf }
 0x195   :  { %587 = vmax.xlane.f32.xlu0 %v586_v36  ;;  %v3678_v37 = vpop.f32.mrf.mxu1 }
 0x197   :  { %v430_v38 = vpop.f32.mrf.mxu1  ;;  %v506_v39 = vpop.f32.mrf.mxu0 }
 0x198   :  { %v592_v40 = vsel %vm281_vm2, %v506_v39, -inf  ;;  %v589_v41 = vsel %vm281_vm2, %v430_v38, -inf }
 0x199   :  { %593 = vmax.xlane.f32.xlu1 %v592_v40  ;;  %590 = vmax.xlane.f32.xlu0 %v589_v41  ;;  %v3683_v42 = vpop.f32.mrf.mxu1  ;;  %v3688_v43 = vpop.f32.mrf.mxu0 }
 0x19b   :  { %v582_v44 = vpop.f32.mrf.mxu1 }
 0x19c   :  { %v595_v45 = vsel %vm281_vm2, %v582_v44, -inf }
 0x19d   :  { %596 = vmax.xlane.f32.xlu1 %v595_v45  ;;  %v3693_v46 = vpop.f32.mrf.mxu1 }
 0x1af   :  { %274 = vrot.lane.b32.xlu0 %v3474_v47, %s3999_s29 }
 0x21e   :  { %v588_v48 = vpop.xlane.xlu0 %587 }
 0x21f   :  { %v598_v55 = vsub.f32 %v354_v35, %v588_v48 }
 0x221   :  { %v602_v57 = vmul.f32 1.442695, %v598_v55 }
 0x222   :  { %v591_v49 = vpop.xlane.xlu0 %590  ;;  %v594_v56 = vpop.xlane.xlu1 %593 }
 0x223   :  { %v599_v58 = vsub.f32 %v430_v38, %v591_v49  ;;  %3891 = vpow2.f32 %v602_v57  ;;  %v600_v59 = vsub.f32 %v506_v39, %v594_v56 }
 0x225   :  { %v604_v60 = vmul.f32 1.442695, %v599_v58  ;;  %v606_v62 = vmul.f32 1.442695, %v600_v59 }
 0x226   :  { %v275_v50 = vpop.permute.xlu0 %274  ;;  %v597_v61 = vpop.xlane.xlu1 %596 }
 0x227   :  { %v4161_v51 = vadd.f32 %v275_v50, %v242_v19  ;;  %v4163_v52 = vadd.f32 %v3670_v17, %v275_v50  ;;  %v4167_v53 = vadd.f32 %v275_v50, %v252_v26  ;;  %v4172_v54 = vadd.f32 %v3673_v23, %v275_v50 }
 0x228   :  { %3893 = vpow2.f32 %v604_v60  ;;  %v601_v63 = vsub.f32 %v582_v44, %v597_v61 }
 0x229   :  { %708 = vrot.lane.b32.xlu0 %v4163_v52, %s4000_s30  ;;  %631 = vrot.lane.b32.xlu1 %v4161_v51, %s4000_s30  ;;  %3895 = vpow2.f32 %v606_v62 }
 0x22a   :  { %v608_v0 = vmul.f32 1.442695, %v601_v63 }
 0x22c   :  { %3897 = vpow2.f32 %v608_v0 }
 0x22d   :  { %785 = vrot.lane.b32.xlu0 %v4167_v53, %s4000_s30  ;;  %940 = vrot.lane.b32.xlu1 %v4107_v21, %s4001_s6 }
 0x230   :  { %v3892_v1 = vpop.eup %3891 }
 0x231   :  { %862 = vrot.lane.b32.xlu0 %v4172_v54, %s4000_s30  ;;  %938 = vrot.lane.b32.xlu1 %v4114_v25, %s4001_s6  ;;  %v610_v2 = vsel %vm281_vm2, %v3892_v1, 0.0 }
 0x235   :  { %1018 = vrot.lane.b32.xlu0 %v4117_v28, %s4001_s6  ;;  %1096 = vrot.lane.b32.xlu1 %v4119_v29, %s4001_s6  ;;  %v3894_v3 = vpop.eup %3893 }
 0x236   :  { %v613_v4 = vsel %vm281_vm2, %v3894_v3, 0.0  ;;  %v3896_v5 = vpop.eup %3895 }
 0x237   :  { %v616_v6 = vsel %vm281_vm2, %v3896_v5, 0.0 }
 0x239   :  { %1016 = vrot.lane.b32.xlu0 %v4131_v33, %s4001_s6  ;;  %v3898_v7 = vpop.eup %3897 }
 0x23a   :  { %v619_v8 = vsel %vm281_vm2, %v3898_v7, 0.0 }
 0x23d   :  { %1174 = vrot.lane.b32.xlu0 %v4123_v31, %s4001_s6 }
 0x241   :  { %1172 = vrot.lane.b32.xlu0 %v4137_v34, %s4001_s6 }
 0x259   :  { %611 = vadd.xlane.f32.xlu1 %v610_v2 }
 0x25d   :  { %614 = vadd.xlane.f32.xlu1 %v613_v4 }
 0x261   :  { %617 = vadd.xlane.f32.xlu1 %v616_v6 }
 0x265   :  { %620 = vadd.xlane.f32.xlu1 %v619_v8 }
 0x276   :  { %1094 = vrot.lane.b32.xlu1 %v4125_v32, %s4001_s6 }
 0x29b   :  { %v709_v9 = vpop.permute.xlu0 %708  ;;  %v632_v10 = vpop.permute.xlu1 %631 }
 0x29c   :  { %3695 = vmatpush3.msra.mxu0 %v632_v10  ;;  %3700 = vmatpush3.msra.mxu1 %v709_v9 }
 0x29d   :  { %3704 = vmatprep.subr.mxu0 %v3997_v16  ;;  %3709 = vmatprep.subr.mxu1 %v3997_v16 }
 0x29f   :  { %v941_v11 = vpop.permute.xlu1 %940  ;;  %v786_v17 = vpop.permute.xlu0 %785 }
 0x2a3   :  { %v939_v12 = vpop.permute.xlu1 %938  ;;  %v863_v19 = vpop.permute.xlu0 %862 }
 0x2a7   :  { %v1097_v13 = vpop.permute.xlu1 %1096  ;;  %v1019_v26 = vpop.permute.xlu0 %1018 }
 0x2ab   :  { %v1017_v36 = vpop.permute.xlu0 %1016 }
 0x2af   :  { %v1175_v39 = vpop.permute.xlu0 %1174 }
 0x2b3   :  { %v1173_v41 = vpop.permute.xlu0 %1172 }
 0x2e2   :  { %v612_v14 = vpop.xlane.xlu1 %611 }
 0x2e3   :  { %3899 = vrcp.f32 %v612_v14 }
 0x2e6   :  { %v615_v15 = vpop.xlane.xlu1 %614 }
 0x2e7   :  { %3901 = vrcp.f32 %v615_v15 }
 0x2ea   :  { %v618_v18 = vpop.xlane.xlu1 %617 }
 0x2eb   :  { %3903 = vrcp.f32 %v618_v18 }
 0x2ee   :  { %v621_v20 = vpop.xlane.xlu1 %620 }
 0x2ef   :  { %3905 = vrcp.f32 %v621_v20 }
 0x2f0   :  { %v3900_v22 = vpop.eup %3899 }
 0x2f1   :  { %v623_v23 = vmul.f32 %v3900_v22, %v3892_v1 }
 0x2f2   :  { %v1095_v40 = vpop.permute.xlu1 %1094 }
 0x2f3   :  { %3697 = vmatmul.mubr.msk.f32.vlgmr.msra.gmra.mxu0 %vm281_vm2, %v623_v23 }
 0x2f4   :  { %v3902_v24 = vpop.eup %3901  ;;  %3705 = vmatpush3.msra.mxu0 %v786_v17  ;;  %3706 = vmatprep.mubr.msk.f32.mxu0 %vm3998_vm1, %v3997_v16 }
 0x2f5   :  { %v625_v27 = vmul.f32 %v3902_v24, %v3894_v3  ;;  %3714 = vmatprep.subr.mxu0 %v3997_v16 }
 0x2f7   :  { %3702 = vmatmul.mubr.msk.f32.vlgmr.msra.gmra.mxu1 %vm281_vm2, %v625_v27 }
 0x2f8   :  { %v3904_v30 = vpop.eup %3903  ;;  %3710 = vmatpush3.msra.mxu1 %v863_v19  ;;  %3711 = vmatprep.mubr.msk.f32.mxu1 %vm3998_vm1, %v3997_v16 }
 0x2f9   :  { %v627_v35 = vmul.f32 %v3904_v30, %v3896_v5  ;;  %3719 = vmatprep.subr.mxu1 %v3997_v16 }
 0x2fb   :  { %3707 = vmatmul.mubr.msk.f32.vlgmr.msra.gmra.mxu0 %vm281_vm2, %v627_v35 }
 0x2fc   :  { %v3906_v37 = vpop.eup %3905  ;;  %3715 = vmatpush3.xpose.msk.msra.mxu0 %vm281_vm2, %v941_v11  ;;  %3716 = vmatprep.mubr.msk.f32.mxu0 %vm3998_vm1, %v3997_v16 }
 0x2fd   :  { %3724 = vmatprep.subr.mxu0 %v3997_v16  ;;  %v629_v38 = vmul.f32 %v3906_v37, %v3898_v7 }
 0x2ff   :  { %3712 = vmatmul.mubr.msk.f32.vlgmr.msra.gmra.mxu1 %vm281_vm2, %v629_v38  ;;  %3717 = vmatmul.mubr.msk.f32.vlgmr.msra.gmra.mxu0 %vm281_vm2, %v939_v12 }
 0x300   :  { %3720 = vmatpush3.xpose.msk.msra.mxu1 %vm281_vm2, %v1019_v26  ;;  %3725 = vmatpush3.xpose.msk.msra.mxu0 %vm281_vm2, %v1097_v13 }
 0x301   :  { %3721 = vmatprep.mubr.msk.f32.mxu1 %vm3998_vm1, %v3997_v16  ;;  %3726 = vmatprep.mubr.msk.f32.mxu0 %vm3998_vm1, %v3997_v16 }
 0x302   :  { %3729 = vmatprep.subr.mxu1 %v3997_v16  ;;  %3734 = vmatprep.subr.mxu0 %v3997_v16 }
 0x303   :  { %3722 = vmatmul.mubr.msk.f32.vlgmr.msra.gmra.mxu1 %vm281_vm2, %v1017_v36  ;;  %3727 = vmatmul.mubr.msk.f32.vlgmr.msra.gmra.mxu0 %vm281_vm2, %v1095_v40 }
 0x304   :  { %3730 = vmatpush3.xpose.msk.msra.mxu1 %vm281_vm2, %v1175_v39  ;;  %3731 = vmatprep.mubr.msk.f32.mxu1 %vm3998_vm1, %v3997_v16 }
 0x305   :  { %3739 = vmatprep.subr.mxu1 %v3997_v16  ;;  %3736 = vmatprep.mubr.msk.f32.mxu0 %vm3998_vm1, %v3997_v16 }
 0x307   :  { %3732 = vmatmul.mubr.msk.f32.vlgmr.msra.gmra.mxu1 %vm281_vm2, %v1173_v41 }
 0x308   :  { %3741 = vmatprep.mubr.msk.f32.mxu1 %vm3998_vm1, %v3997_v16 }
 0x3b3   :  { %v4229_v42 = vpop.f32.mrf.mxu0 }
 0x3b5   :  { %v3698_v43 = vpop.f32.mrf.mxu0 }
 0x3b7   :  { %v4231_v44 = vpop.f32.mrf.mxu1 }
 0x3b9   :  { %v3703_v45 = vpop.f32.mrf.mxu1 }
 0x3bb   :  { %v4233_v46 = vpop.f32.mrf.mxu0 }
 0x3bd   :  { %v3708_v47 = vpop.f32.mrf.mxu0 }
 0x3bf   :  { %v4235_v48 = vpop.f32.mrf.mxu1  ;;  %v1012_v49 = vpop.f32.mrf.mxu0 }
 0x3c0   :  { %v1250_v50 = vsel %vm281_vm2, %v1012_v49, -inf }
 0x3c1   :  { %1251 = vmax.xlane.f32.xlu1 %v1250_v50  ;;  %v3713_v55 = vpop.f32.mrf.mxu1  ;;  %v3718_v56 = vpop.f32.mrf.mxu0 }
 0x3c3   :  { %v1090_v57 = vpop.f32.mrf.mxu1  ;;  %v1168_v58 = vpop.f32.mrf.mxu0 }
 0x3c4   :  { %v1253_v59 = vsel %vm281_vm2, %v1090_v57, -inf  ;;  %v1256_v63 = vsel %vm281_vm2, %v1168_v58, -inf }
 0x3c5   :  { %v3728_v60 = vpop.f32.mrf.mxu0  ;;  %1254 = vmax.xlane.f32.xlu0 %v1253_v59  ;;  %v3723_v61 = vpop.f32.mrf.mxu1 }
 0x3c7   :  { %v1246_v62 = vpop.f32.mrf.mxu1 }
 0x3c8   :  { %v1259_v1 = vsel %vm281_vm2, %v1246_v62, -inf }
 0x3c9   :  { %1257 = vmax.xlane.f32.xlu0 %v1256_v63  ;;  %v3733_v0 = vpop.f32.mrf.mxu1 }
 0x3cd   :  { %1260 = vmax.xlane.f32.xlu0 %v1259_v1 }
 0x3d2   :  { %1294 = vrot.lane.b32.xlu1 %v4161_v51, %s4002_s7 }
 0x3d6   :  { %1446 = vrot.lane.b32.xlu1 %v4167_v53, %s4002_s7 }
 0x3da   :  { %1522 = vrot.lane.b32.xlu1 %v4172_v54, %s4002_s7 }
 0x3de   :  { %1600 = vrot.lane.b32.xlu1 %v4107_v21, %s4003_s8 }
 0x3e2   :  { %1598 = vrot.lane.b32.xlu1 %v4114_v25, %s4003_s8 }
 0x3e3   :  { %1370 = vrot.lane.b32.xlu0 %v4163_v52, %s4002_s7 }
 0x3e7   :  { %1678 = vrot.lane.b32.xlu0 %v4117_v28, %s4003_s8 }
 0x44a   :  { %v1252_v2 = vpop.xlane.xlu1 %1251 }
 0x44b   :  { %v1262_v3 = vsub.f32 %v1012_v49, %v1252_v2 }
 0x44d   :  { %v1266_v4 = vmul.f32 1.442695, %v1262_v3 }
 0x44e   :  { %v1295_v5 = vpop.permute.xlu1 %1294  ;;  %v1255_v6 = vpop.xlane.xlu0 %1254 }
 0x44f   :  { %3907 = vpow2.f32 %v1266_v4  ;;  %v1263_v7 = vsub.f32 %v1090_v57, %v1255_v6  ;;  %3735 = vmatpush3.msra.mxu0 %v1295_v5 }
 0x450   :  { %3744 = vmatprep.subr.mxu0 %v3997_v16 }
 0x451   :  { %v1268_v8 = vmul.f32 1.442695, %v1263_v7 }
 0x452   :  { %v1258_v9 = vpop.xlane.xlu0 %1257  ;;  %v1447_v27 = vpop.permute.xlu1 %1446 }
 0x453   :  { %3909 = vpow2.f32 %v1268_v8  ;;  %v1264_v10 = vsub.f32 %v1168_v58, %v1258_v9 }
 0x455   :  { %v1270_v11 = vmul.f32 1.442695, %v1264_v10 }
 0x456   :  { %v1261_v12 = vpop.xlane.xlu0 %1260  ;;  %v1523_v30 = vpop.permute.xlu1 %1522 }
 0x457   :  { %3911 = vpow2.f32 %v1270_v11  ;;  %v1265_v13 = vsub.f32 %v1246_v62, %v1261_v12 }
 0x459   :  { %v1272_v14 = vmul.f32 1.442695, %v1265_v13 }
 0x45a   :  { %v1371_v15 = vpop.permute.xlu0 %1370  ;;  %v1601_v35 = vpop.permute.xlu1 %1600 }
 0x45b   :  { %3913 = vpow2.f32 %v1272_v14  ;;  %3740 = vmatpush3.msra.mxu1 %v1371_v15 }
 0x45c   :  { %v3908_v17 = vpop.eup %3907  ;;  %3749 = vmatprep.subr.mxu1 %v3997_v16 }
 0x45d   :  { %v1274_v18 = vsel %vm281_vm2, %v3908_v17, 0.0 }
 0x45e   :  { %1275 = vadd.xlane.f32.xlu1 %v1274_v18  ;;  %v1599_v36 = vpop.permute.xlu1 %1598  ;;  %v1679_v37 = vpop.permute.xlu0 %1678 }
 0x460   :  { %v3910_v19 = vpop.eup %3909 }
 0x461   :  { %v1277_v20 = vsel %vm281_vm2, %v3910_v19, 0.0 }
 0x462   :  { %1278 = vadd.xlane.f32.xlu0 %v1277_v20 }
 0x464   :  { %v3912_v22 = vpop.eup %3911 }
 0x465   :  { %v1280_v23 = vsel %vm281_vm2, %v3912_v22, 0.0 }
 0x466   :  { %1281 = vadd.xlane.f32.xlu1 %v1280_v23 }
 0x468   :  { %v3914_v24 = vpop.eup %3913 }
 0x469   :  { %v1283_v26 = vsel %vm281_vm2, %v3914_v24, 0.0 }
 0x46a   :  { %1284 = vadd.xlane.f32.xlu0 %v1283_v26 }
 0x477   :  { %1756 = vrot.lane.b32.xlu1 %v4119_v29, %s4003_s8 }
 0x47b   :  { %1754 = vrot.lane.b32.xlu1 %v4125_v32, %s4003_s8 }
 0x480   :  { %1676 = vrot.lane.b32.xlu0 %v4131_v33, %s4003_s8 }
 0x484   :  { %1834 = vrot.lane.b32.xlu0 %v4123_v31, %s4003_s8 }
 0x488   :  { %1832 = vrot.lane.b32.xlu0 %v4137_v34, %s4003_s8 }
 0x4e7   :  { %v1276_v38 = vpop.xlane.xlu1 %1275 }
 0x4e8   :  { %3915 = vrcp.f32 %v1276_v38 }
 0x4eb   :  { %v1279_v39 = vpop.xlane.xlu0 %1278 }
 0x4ec   :  { %3917 = vrcp.f32 %v1279_v39 }
 0x4ef   :  { %v1282_v40 = vpop.xlane.xlu1 %1281 }
 0x4f0   :  { %3919 = vrcp.f32 %v1282_v40 }
 0x4f3   :  { %v1285_v41 = vpop.xlane.xlu0 %1284  ;;  %v1757_v58 = vpop.permute.xlu1 %1756 }
 0x4f4   :  { %3921 = vrcp.f32 %v1285_v41 }
 0x4f5   :  { %v3916_v43 = vpop.eup %3915 }
 0x4f6   :  { %v1287_v45 = vmul.f32 %v3916_v43, %v3908_v17 }
 0x4f7   :  { %v1677_v56 = vpop.permute.xlu0 %1676  ;;  %v1755_v61 = vpop.permute.xlu1 %1754 }
 0x4f8   :  { %3737 = vmatmul.mubr.msk.f32.vlgmr.msra.gmra.mxu0 %vm281_vm2, %v1287_v45 }
 0x4f9   :  { %v3918_v47 = vpop.eup %3917  ;;  %3745 = vmatpush3.msra.mxu0 %v1447_v27  ;;  %3746 = vmatprep.mubr.msk.f32.mxu0 %vm3998_vm1, %v3997_v16 }
 0x4fa   :  { %v1289_v49 = vmul.f32 %v3918_v47, %v3910_v19  ;;  %3754 = vmatprep.subr.mxu0 %v3997_v16 }
 0x4fb   :  { %v1835_v60 = vpop.permute.xlu0 %1834 }
 0x4fc   :  { %3742 = vmatmul.mubr.msk.f32.vlgmr.msra.gmra.mxu1 %vm281_vm2, %v1289_v49 }
 0x4fd   :  { %v3920_v50 = vpop.eup %3919  ;;  %3750 = vmatpush3.msra.mxu1 %v1523_v30  ;;  %3751 = vmatprep.mubr.msk.f32.mxu1 %vm3998_vm1, %v3997_v16 }
 0x4fe   :  { %v1291_v55 = vmul.f32 %v3920_v50, %v3912_v22  ;;  %3759 = vmatprep.subr.mxu1 %v3997_v16 }
 0x4ff   :  { %v1833_v62 = vpop.permute.xlu0 %1832 }
 0x500   :  { %3747 = vmatmul.mubr.msk.f32.vlgmr.msra.gmra.mxu0 %vm281_vm2, %v1291_v55 }
 0x501   :  { %v3922_v57 = vpop.eup %3921  ;;  %3755 = vmatpush3.xpose.msk.msra.mxu0 %vm281_vm2, %v1601_v35  ;;  %3756 = vmatprep.mubr.msk.f32.mxu0 %vm3998_vm1, %v3997_v16 }
 0x502   :  { %3764 = vmatprep.subr.mxu0 %v3997_v16  ;;  %v1293_v59 = vmul.f32 %v3922_v57, %v3914_v24 }
 0x504   :  { %3752 = vmatmul.mubr.msk.f32.vlgmr.msra.gmra.mxu1 %vm281_vm2, %v1293_v59  ;;  %3757 = vmatmul.mubr.msk.f32.vlgmr.msra.gmra.mxu0 %vm281_vm2, %v1599_v36 }
 0x505   :  { %3760 = vmatpush3.xpose.msk.msra.mxu1 %vm281_vm2, %v1679_v37  ;;  %3765 = vmatpush3.xpose.msk.msra.mxu0 %vm281_vm2, %v1757_v58 }
 0x506   :  { %3761 = vmatprep.mubr.msk.f32.mxu1 %vm3998_vm1, %v3997_v16  ;;  %3766 = vmatprep.mubr.msk.f32.mxu0 %vm3998_vm1, %v3997_v16 }
 0x507   :  { %3769 = vmatprep.subr.mxu1 %v3997_v16  ;;  %3774 = vmatprep.subr.mxu0 %v3997_v16 }
 0x508   :  { %3762 = vmatmul.mubr.msk.f32.vlgmr.msra.gmra.mxu1 %vm281_vm2, %v1677_v56  ;;  %3767 = vmatmul.mubr.msk.f32.vlgmr.msra.gmra.mxu0 %vm281_vm2, %v1755_v61 }
 0x509   :  { %3770 = vmatpush3.xpose.msk.msra.mxu1 %vm281_vm2, %v1835_v60  ;;  %3771 = vmatprep.mubr.msk.f32.mxu1 %vm3998_vm1, %v3997_v16 }
 0x50a   :  { %3779 = vmatprep.subr.mxu1 %v3997_v16  ;;  %3776 = vmatprep.mubr.msk.f32.mxu0 %vm3998_vm1, %v3997_v16 }
 0x50c   :  { %3772 = vmatmul.mubr.msk.f32.vlgmr.msra.gmra.mxu1 %vm281_vm2, %v1833_v62 }
 0x50d   :  { %3781 = vmatprep.mubr.msk.f32.mxu1 %vm3998_vm1, %v3997_v16 }
 0x5b8   :  { %v4301_v63 = vpop.f32.mrf.mxu0 }
 0x5ba   :  { %v3738_v0 = vpop.f32.mrf.mxu0 }
 0x5bc   :  { %v4303_v1 = vpop.f32.mrf.mxu1 }
 0x5be   :  { %v3743_v2 = vpop.f32.mrf.mxu1 }
 0x5c0   :  { %v4305_v3 = vpop.f32.mrf.mxu0 }
 0x5c2   :  { %v3748_v4 = vpop.f32.mrf.mxu0 }
 0x5c4   :  { %v4307_v5 = vpop.f32.mrf.mxu1  ;;  %v1672_v6 = vpop.f32.mrf.mxu0 }
 0x5c5   :  { %v1910_v7 = vsel %vm281_vm2, %v1672_v6, -inf }
 0x5c6   :  { %1911 = vmax.xlane.f32.xlu1 %v1910_v7  ;;  %v3753_v8 = vpop.f32.mrf.mxu1  ;;  %v3758_v9 = vpop.f32.mrf.mxu0 }
 0x5c8   :  { %v1750_v10 = vpop.f32.mrf.mxu1  ;;  %v1828_v11 = vpop.f32.mrf.mxu0 }
 0x5c9   :  { %v1913_v12 = vsel %vm281_vm2, %v1750_v10, -inf  ;;  %v1916_v17 = vsel %vm281_vm2, %v1828_v11, -inf }
 0x5ca   :  { %v3768_v13 = vpop.f32.mrf.mxu0  ;;  %1914 = vmax.xlane.f32.xlu0 %v1913_v12  ;;  %v3763_v14 = vpop.f32.mrf.mxu1 }
 0x5cc   :  { %v1906_v15 = vpop.f32.mrf.mxu1 }
 0x5cd   :  { %v1919_v19 = vsel %vm281_vm2, %v1906_v15, -inf }
 0x5ce   :  { %1917 = vmax.xlane.f32.xlu0 %v1916_v17  ;;  %v3773_v18 = vpop.f32.mrf.mxu1 }
 0x5d2   :  { %1920 = vmax.xlane.f32.xlu0 %v1919_v19 }
 0x5d7   :  { %1954 = vrot.lane.b32.xlu1 %v4161_v51, %s4004_s9 }
 0x5db   :  { %2106 = vrot.lane.b32.xlu1 %v4167_v53, %s4004_s9 }
 0x5df   :  { %2182 = vrot.lane.b32.xlu1 %v4172_v54, %s4004_s9 }
 0x5e3   :  { %2260 = vrot.lane.b32.xlu1 %v4107_v21, %s4005_s10 }
 0x5e7   :  { %2258 = vrot.lane.b32.xlu1 %v4114_v25, %s4005_s10 }
 0x5e8   :  { %2030 = vrot.lane.b32.xlu0 %v4163_v52, %s4004_s9 }
 0x5ec   :  { %2338 = vrot.lane.b32.xlu0 %v4117_v28, %s4005_s10 }
 0x64f   :  { %v1912_v20 = vpop.xlane.xlu1 %1911 }
 0x650   :  { %v1922_v22 = vsub.f32 %v1672_v6, %v1912_v20 }
 0x652   :  { %v1926_v23 = vmul.f32 1.442695, %v1922_v22 }
 0x653   :  { %v1955_v24 = vpop.permute.xlu1 %1954  ;;  %v1915_v26 = vpop.xlane.xlu0 %1914 }
 0x654   :  { %3923 = vpow2.f32 %v1926_v23  ;;  %v1923_v27 = vsub.f32 %v1750_v10, %v1915_v26  ;;  %3775 = vmatpush3.msra.mxu0 %v1955_v24 }
 0x655   :  { %3784 = vmatprep.subr.mxu0 %v3997_v16 }
 0x656   :  { %v1928_v30 = vmul.f32 1.442695, %v1923_v27 }
 0x657   :  { %v1918_v21 = vpop.xlane.xlu0 %1917  ;;  %v2107_v55 = vpop.permute.xlu1 %2106 }
 0x658   :  { %3925 = vpow2.f32 %v1928_v30  ;;  %v1924_v35 = vsub.f32 %v1828_v11, %v1918_v21 }
 0x65a   :  { %v1930_v25 = vmul.f32 1.442695, %v1924_v35 }
 0x65b   :  { %v1921_v36 = vpop.xlane.xlu0 %1920  ;;  %v2183_v56 = vpop.permute.xlu1 %2182 }
 0x65c   :  { %3927 = vpow2.f32 %v1930_v25  ;;  %v1925_v37 = vsub.f32 %v1906_v15, %v1921_v36 }
 0x65e   :  { %v1932_v38 = vmul.f32 1.442695, %v1925_v37 }
 0x65f   :  { %v2031_v28 = vpop.permute.xlu0 %2030  ;;  %v2261_v57 = vpop.permute.xlu1 %2260 }
 0x660   :  { %3929 = vpow2.f32 %v1932_v38  ;;  %3780 = vmatpush3.msra.mxu1 %v2031_v28 }
 0x661   :  { %v3924_v39 = vpop.eup %3923  ;;  %3789 = vmatprep.subr.mxu1 %v3997_v16 }
 0x662   :  { %v1934_v40 = vsel %vm281_vm2, %v3924_v39, 0.0 }
 0x663   :  { %1935 = vadd.xlane.f32.xlu1 %v1934_v40  ;;  %v2259_v58 = vpop.permute.xlu1 %2258  ;;  %v2339_v59 = vpop.permute.xlu0 %2338 }
 0x665   :  { %v3926_v41 = vpop.eup %3925 }
 0x666   :  { %v1937_v43 = vsel %vm281_vm2, %v3926_v41, 0.0 }
 0x667   :  { %1938 = vadd.xlane.f32.xlu0 %v1937_v43 }
 0x669   :  { %v3928_v45 = vpop.eup %3927 }
 0x66a   :  { %v1940_v47 = vsel %vm281_vm2, %v3928_v45, 0.0 }
 0x66b   :  { %1941 = vadd.xlane.f32.xlu1 %v1940_v47 }
 0x66d   :  { %v3930_v49 = vpop.eup %3929 }
 0x66e   :  { %v1943_v50 = vsel %vm281_vm2, %v3930_v49, 0.0 }
 0x66f   :  { %1944 = vadd.xlane.f32.xlu0 %v1943_v50 }
 0x67c   :  { %2416 = vrot.lane.b32.xlu1 %v4119_v29, %s4005_s10 }
 0x680   :  { %2414 = vrot.lane.b32.xlu1 %v4125_v32, %s4005_s10 }
 0x685   :  { %2336 = vrot.lane.b32.xlu0 %v4131_v33, %s4005_s10 }
 0x689   :  { %2494 = vrot.lane.b32.xlu0 %v4123_v31, %s4005_s10 }
 0x68d   :  { %2492 = vrot.lane.b32.xlu0 %v4137_v34, %s4005_s10 }
 0x6ec   :  { %v1936_v60 = vpop.xlane.xlu1 %1935 }
 0x6ed   :  { %3931 = vrcp.f32 %v1936_v60 }
 0x6f0   :  { %v1939_v29 = vpop.xlane.xlu0 %1938 }
 0x6f1   :  { %3933 = vrcp.f32 %v1939_v29 }
 0x6f4   :  { %v1942_v61 = vpop.xlane.xlu1 %1941 }
 0x6f5   :  { %3935 = vrcp.f32 %v1942_v61 }
 0x6f8   :  { %v1945_v32 = vpop.xlane.xlu0 %1944  ;;  %v2417_v7 = vpop.permute.xlu1 %2416 }
 0x6f9   :  { %3937 = vrcp.f32 %v1945_v32 }
 0x6fa   :  { %v3932_v33 = vpop.eup %3931 }
 0x6fb   :  { %v1947_v62 = vmul.f32 %v3932_v33, %v3924_v39 }
 0x6fc   :  { %v2337_v4 = vpop.permute.xlu0 %2336  ;;  %v2415_v10 = vpop.permute.xlu1 %2414 }
 0x6fd   :  { %3777 = vmatmul.mubr.msk.f32.vlgmr.msra.gmra.mxu0 %vm281_vm2, %v1947_v62 }
 0x6fe   :  { %v3934_v31 = vpop.eup %3933  ;;  %3785 = vmatpush3.msra.mxu0 %v2107_v55  ;;  %3786 = vmatprep.mubr.msk.f32.mxu0 %vm3998_vm1, %v3997_v16 }
 0x6ff   :  { %v1949_v34 = vmul.f32 %v3934_v31, %v3926_v41  ;;  %3794 = vmatprep.subr.mxu0 %v3997_v16 }
 0x700   :  { %v2495_v9 = vpop.permute.xlu0 %2494 }
 0x701   :  { %3782 = vmatmul.mubr.msk.f32.vlgmr.msra.gmra.mxu1 %vm281_vm2, %v1949_v34 }
 0x702   :  { %v3936_v0 = vpop.eup %3935  ;;  %3790 = vmatpush3.msra.mxu1 %v2183_v56  ;;  %3791 = vmatprep.mubr.msk.f32.mxu1 %vm3998_vm1, %v3997_v16 }
 0x703   :  { %v1951_v2 = vmul.f32 %v3936_v0, %v3928_v45  ;;  %3799 = vmatprep.subr.mxu1 %v3997_v16 }
 0x704   :  { %v2493_v11 = vpop.permute.xlu0 %2492 }
 0x705   :  { %3787 = vmatmul.mubr.msk.f32.vlgmr.msra.gmra.mxu0 %vm281_vm2, %v1951_v2 }
 0x706   :  { %v3938_v6 = vpop.eup %3937  ;;  %3795 = vmatpush3.xpose.msk.msra.mxu0 %vm281_vm2, %v2261_v57  ;;  %3796 = vmatprep.mubr.msk.f32.mxu0 %vm3998_vm1, %v3997_v16 }
 0x707   :  { %3804 = vmatprep.subr.mxu0 %v3997_v16  ;;  %v1953_v8 = vmul.f32 %v3938_v6, %v3930_v49 }
 0x709   :  { %3792 = vmatmul.mubr.msk.f32.vlgmr.msra.gmra.mxu1 %vm281_vm2, %v1953_v8  ;;  %3797 = vmatmul.mubr.msk.f32.vlgmr.msra.gmra.mxu0 %vm281_vm2, %v2259_v58 }
 0x70a   :  { %3800 = vmatpush3.xpose.msk.msra.mxu1 %vm281_vm2, %v2339_v59  ;;  %3805 = vmatpush3.xpose.msk.msra.mxu0 %vm281_vm2, %v2417_v7 }
 0x70b   :  { %3801 = vmatprep.mubr.msk.f32.mxu1 %vm3998_vm1, %v3997_v16  ;;  %3806 = vmatprep.mubr.msk.f32.mxu0 %vm3998_vm1, %v3997_v16 }
 0x70c   :  { %3809 = vmatprep.subr.mxu1 %v3997_v16  ;;  %3814 = vmatprep.subr.mxu0 %v3997_v16 }
 0x70d   :  { %3802 = vmatmul.mubr.msk.f32.vlgmr.msra.gmra.mxu1 %vm281_vm2, %v2337_v4  ;;  %3807 = vmatmul.mubr.msk.f32.vlgmr.msra.gmra.mxu0 %vm281_vm2, %v2415_v10  ;;  %v3454_v10 = vld [vmem:[%s4533_s2 + $0x30] sm:$0xff] }
 0x70e   :  { %3810 = vmatpush3.xpose.msk.msra.mxu1 %vm281_vm2, %v2495_v9  ;;  %3811 = vmatprep.mubr.msk.f32.mxu1 %vm3998_vm1, %v3997_v16  ;;  %v3455_v9 = vld [vmem:[%s4533_s2 + $0x38] sm:$0xff] }
 0x70f   :  { %3816 = vmatprep.mubr.msk.f32.mxu0 %vm3998_vm1, %v3997_v16  ;;  %3819 = vmatprep.subr.mxu1 %v3997_v16 }
 0x711   :  { %3812 = vmatmul.mubr.msk.f32.vlgmr.msra.gmra.mxu1 %vm281_vm2, %v2493_v11  ;;  %v3452_v11 = vld [vmem:[%s4533_s2 + $0x20] sm:$0xff] }
 0x712   :  { %3821 = vmatprep.mubr.msk.f32.mxu1 %vm3998_vm1, %v3997_v16 }
 0x7bd   :  { %v2026_v12 = vpop.f32.mrf.mxu0 }
 0x7bf   :  { %v3778_v13 = vpop.f32.mrf.mxu0 }
 0x7c1   :  { %v4373_v14 = vpop.f32.mrf.mxu1 }
 0x7c3   :  { %v3783_v15 = vpop.f32.mrf.mxu1 }
 0x7c5   :  { %v2178_v17 = vpop.f32.mrf.mxu0 }
 0x7c7   :  { %v3788_v18 = vpop.f32.mrf.mxu0 }
 0x7c9   :  { %v2254_v19 = vpop.f32.mrf.mxu1  ;;  %v2332_v20 = vpop.f32.mrf.mxu0 }
 0x7ca   :  { %v2570_v22 = vsel %vm281_vm2, %v2332_v20, -inf }
 0x7cb   :  { %2571 = vmax.xlane.f32.xlu1 %v2570_v22  ;;  %v3793_v23 = vpop.f32.mrf.mxu1  ;;  %v3798_v24 = vpop.f32.mrf.mxu0 }
 0x7cd   :  { %v2410_v26 = vpop.f32.mrf.mxu1  ;;  %v2488_v27 = vpop.f32.mrf.mxu0 }
 0x7ce   :  { %v2573_v30 = vsel %vm281_vm2, %v2410_v26, -inf  ;;  %v2576_v36 = vsel %vm281_vm2, %v2488_v27, -inf }
 0x7cf   :  { %v3808_v21 = vpop.f32.mrf.mxu0  ;;  %2574 = vmax.xlane.f32.xlu0 %v2573_v30  ;;  %v3803_v35 = vpop.f32.mrf.mxu1 }
 0x7d1   :  { %v2566_v25 = vpop.f32.mrf.mxu1 }
 0x7d2   :  { %v2579_v38 = vsel %vm281_vm2, %v2566_v25, -inf }
 0x7d3   :  { %2577 = vmax.xlane.f32.xlu0 %v2576_v36  ;;  %v3813_v37 = vpop.f32.mrf.mxu1 }
 0x7d7   :  { %2580 = vmax.xlane.f32.xlu0 %v2579_v38 }
 0x7dc   :  { %2614 = vrot.lane.b32.xlu1 %v4161_v51, %s4006_s11 }
 0x854   :  { %v2572_v28 = vpop.xlane.xlu1 %2571 }
 0x855   :  { %v2582_v39 = vsub.f32 %v2332_v20, %v2572_v28 }
 0x857   :  { %v2586_v40 = vmul.f32 1.442695, %v2582_v39 }
 0x858   :  { %v2615_v41 = vpop.permute.xlu1 %2614  ;;  %v2575_v43 = vpop.xlane.xlu0 %2574 }
 0x859   :  { %3939 = vpow2.f32 %v2586_v40  ;;  %v2583_v45 = vsub.f32 %v2410_v26, %v2575_v43  ;;  %3815 = vmatpush3.msra.mxu0 %v2615_v41 }
 0x85a   :  { %3824 = vmatprep.subr.mxu0 %v3997_v16 }
 0x85b   :  { %v2588_v47 = vmul.f32 1.442695, %v2583_v45 }
 0x85c   :  { %v2578_v49 = vpop.xlane.xlu0 %2577 }
 0x85d   :  { %3941 = vpow2.f32 %v2588_v47  ;;  %v2584_v50 = vsub.f32 %v2488_v27, %v2578_v49 }
 0x85f   :  { %v2590_v55 = vmul.f32 1.442695, %v2584_v50 }
 0x860   :  { %v2581_v56 = vpop.xlane.xlu0 %2580 }
 0x861   :  { %3943 = vpow2.f32 %v2590_v55  ;;  %v2585_v57 = vsub.f32 %v2566_v25, %v2581_v56 }
 0x863   :  { %v2592_v58 = vmul.f32 1.442695, %v2585_v57 }
 0x865   :  { %3945 = vpow2.f32 %v2592_v58 }
 0x866   :  { %v3940_v51 = vpop.eup %3939 }
 0x867   :  { %v2594_v59 = vsel %vm281_vm2, %v3940_v51, 0.0 }
 0x868   :  { %2595 = vadd.xlane.f32.xlu1 %v2594_v59  ;;  %v3971_v59 = vld [vmem:[%s4531_s0 + $0x8] sm:$0xff] }
 0x86a   :  { %v3942_v60 = vpop.eup %3941 }
 0x86b   :  { %v2597_v29 = vsel %vm281_vm2, %v3942_v60, 0.0 }
 0x86c   :  { %2598 = vadd.xlane.f32.xlu0 %v2597_v29  ;;  %v3972_v29 = vld [vmem:[%s4531_s0] sm:$0xff] }
 0x86e   :  { %v3944_v61 = vpop.eup %3943 }
 0x86f   :  { %v2600_v32 = vsel %vm281_vm2, %v3944_v61, 0.0 }
 0x870   :  { %2601 = vadd.xlane.f32.xlu1 %v2600_v32 }
 0x872   :  { %v3946_v33 = vpop.eup %3945 }
 0x873   :  { %v2603_v62 = vsel %vm281_vm2, %v3946_v33, 0.0 }
 0x874   :  { %2604 = vadd.xlane.f32.xlu0 %v2603_v62 }
 0x881   :  { %2766 = vrot.lane.b32.xlu1 %v4167_v53, %s4006_s11 }
 0x885   :  { %2842 = vrot.lane.b32.xlu1 %v4172_v54, %s4006_s11 }
 0x889   :  { %2922 = vrot.lane.b32.xlu1 %v4301_v63, %s4007_s12 }
 0x88a   :  { %2690 = vrot.lane.b32.xlu0 %v4163_v52, %s4006_s11 }
 0x88d   :  { %2938 = vrot.lane.b32.xlu1 %v2026_v12, %s4008_s13 }
 0x88e   :  { %2924 = vrot.lane.b32.xlu0 %v4303_v1, %s4007_s12 }
 0x891   :  { %2926 = vrot.lane.b32.xlu1 %v4305_v3, %s4007_s12 }
 0x892   :  { %2940 = vrot.lane.b32.xlu0 %v4373_v14, %s4008_s13 }
 0x895   :  { %2942 = vrot.lane.b32.xlu1 %v2178_v17, %s4008_s13 }
 0x896   :  { %2928 = vrot.lane.b32.xlu0 %v4307_v5, %s4007_s12 }
 0x89a   :  { %2944 = vrot.lane.b32.xlu0 %v2254_v19, %s4008_s13 }
 0x8f1   :  { %v2596_v53 = vpop.xlane.xlu1 %2595 }
 0x8f2   :  { %3947 = vrcp.f32 %v2596_v53 }
 0x8f5   :  { %v2599_v54 = vpop.xlane.xlu0 %2598 }
 0x8f6   :  { %3949 = vrcp.f32 %v2599_v54 }
 0x8f9   :  { %v2602_v52 = vpop.xlane.xlu1 %2601 }
 0x8fa   :  { %3951 = vrcp.f32 %v2602_v52  ;;  %v3973_v52 = vld [vmem:[%s4531_s0 + $0x10] sm:$0xff] }
 0x8fd   :  { %v2605_v63 = vpop.xlane.xlu0 %2604  ;;  %v2767_v1 = vpop.permute.xlu1 %2766 }
 0x8fe   :  { %3953 = vrcp.f32 %v2605_v63 }
 0x8ff   :  { %v3948_v31 = vpop.eup %3947 }
 0x900   :  { %v2607_v34 = vmul.f32 %v3948_v31, %v3940_v51 }
 0x901   :  { %v2691_v0 = vpop.permute.xlu0 %2690  ;;  %v2843_v2 = vpop.permute.xlu1 %2842 }
 0x902   :  { %3817 = vmatmul.mubr.msk.f32.vlgmr.msra.gmra.mxu0 %vm281_vm2, %v2607_v34  ;;  %3820 = vmatpush3.msra.mxu1 %v2691_v0 }
 0x903   :  { %v3950_v3 = vpop.eup %3949  ;;  %3825 = vmatpush3.msra.mxu0 %v2767_v1  ;;  %3829 = vmatprep.subr.mxu1 %v3997_v16  ;;  %v3974_v1 = vld [vmem:[%s4531_s0 + $0x18] sm:$0xff]  ;;  %s4010_s0 = smov [#allocation2]  }
 0x904   :  { %v2609_v5 = vmul.f32 %v3950_v3, %v3942_v60  ;;  %3826 = vmatprep.mubr.msk.f32.mxu0 %vm3998_vm1, %v3997_v16  ;;  %3834 = vmatprep.subr.mxu0 %v3455_v9  ;;  %s3441_s6 = sshll.u32 %s4010_s0, 4  ;;  %s3442_s6 = int_to_ptr.vmem [resolvable:$true] %s3441_s6 }
 0x905   :  { %v2923_v22 = vpop.permute.xlu1 %2922  ;;  %v2925_v23 = vpop.permute.xlu0 %2924  ;;  %p3980_p1 = scmp.lt.s32.totalorder %s3442_s6, %s3442_s6 }
 0x906   :  { %3822 = vmatmul.mubr.msk.f32.vlgmr.msra.gmra.mxu1 %vm281_vm2, %v2609_v5  ;;  %v2966_v35 = vsel %vm281_vm2, %v4229_v42, %v2923_v22  ;;  %v2967_v28 = vsel %vm281_vm2, %v4231_v44, %v2925_v23  ;;  %v3459_v23 = vld [vmem:[%s4533_s2 + $0x58] sm:$0xff] }
 0x907   :  { %v3952_v4 = vpop.eup %3951  ;;  %3830 = vmatpush3.msra.mxu1 %v2843_v2  ;;  %3831 = vmatprep.mubr.msk.f32.mxu1 %vm3998_vm1, %v3997_v16  ;;  %v3453_v16 = vld [vmem:[%s4533_s2 + $0x28] sm:$0xff] }
 0x908   :  { %v2611_v6 = vmul.f32 %v3952_v4, %v3944_v61  ;;  %3848 = vmatprep.subr.mxu1 %v3459_v23 }
 0x909   :  { %v2939_v24 = vpop.permute.xlu1 %2938  ;;  %v2941_v26 = vpop.permute.xlu0 %2940 }
 0x90a   :  { %3827 = vmatmul.mubr.msk.f32.vlgmr.msra.gmra.mxu0 %vm281_vm2, %v2611_v6  ;;  %v2971_v25 = vsel %vm2970_vm3, %v2966_v35, %v2939_v24  ;;  %v2972_v39 = vsel %vm2970_vm3, %v2967_v28, %v2941_v26  ;;  %v3458_v24 = vld [vmem:[%s4533_s2 + $0x50] sm:$0xff]  ;;  %v3457_v26 = vld [vmem:[%s4533_s2 + $0x48] sm:$0xff] }
 0x90b   :  { %v3954_v7 = vpop.eup %3953  ;;  %3835 = vmatpush3.msra.mxu0 %v3455_v9 }
 0x90c   :  { %v2613_v8 = vmul.f32 %v3954_v7, %v3946_v33  ;;  %3836 = vmatprep.subr.mxu0 %v3454_v10 }
 0x90d   :  { %3837 = vmatpush3.msra.mxu0 %v3454_v10  ;;  %v2927_v27 = vpop.permute.xlu1 %2926  ;;  %v2929_v30 = vpop.permute.xlu0 %2928 }
 0x90e   :  { %3832 = vmatmul.mubr.msk.f32.vlgmr.msra.gmra.mxu1 %vm281_vm2, %v2613_v8  ;;  %3838 = vmatprep.subr.mxu0 %v3453_v16  ;;  %v2968_v42 = vsel %vm281_vm2, %v4233_v46, %v2927_v27  ;;  %v2969_v44 = vsel %vm281_vm2, %v4235_v48, %v2929_v30  ;;  %v3523_v46 = vld [vmem:[%s4535_s4 + $0x3] ss:$0 sm:$0xff] }
 0x90f   :  { %3839 = vmatpush3.msra.mxu0 %v3453_v16  ;;  %3849 = vmatpush3.msra.mxu1 %v3459_v23  ;;  %v3456_v27 = vld [vmem:[%s4533_s2 + $0x40] sm:$0xff] }
 0x910   :  { %3840 = vmatprep.subr.mxu0 %v3452_v11  ;;  %3850 = vmatprep.subr.mxu1 %v3458_v24 }
 0x911   :  { %3841 = vmatpush3.msra.mxu0 %v3452_v11  ;;  %v2943_v21 = vpop.permute.xlu1 %2942  ;;  %v2945_v36 = vpop.permute.xlu0 %2944  ;;  %3851 = vmatpush3.msra.mxu1 %v3458_v24 }
 0x912   :  { %v2973_v43 = vsel %vm2970_vm3, %v2968_v42, %v2943_v21  ;;  %v2974_v49 = vsel %vm2970_vm3, %v2969_v44, %v2945_v36  ;;  %3852 = vmatprep.subr.mxu1 %v3457_v26 }
 0x913   :  { %3853 = vmatpush3.msra.mxu1 %v3457_v26 }
 0x914   :  { %3854 = vmatprep.subr.mxu1 %v3456_v27 }
 0x915   :  { %3855 = vmatpush3.msra.mxu1 %v3456_v27 }
 0x9c2   :  { %v2686_v12 = vpop.f32.mrf.mxu0 }
 0x9c3   :  { %2954 = vrot.lane.b32.xlu1 %v2686_v12, %s4009_s21 }
 0x9c4   :  { %v3818_v13 = vpop.f32.mrf.mxu0 }
 0x9c6   :  { %v2762_v14 = vpop.f32.mrf.mxu1 }
 0x9c7   :  { %2956 = vrot.lane.b32.xlu0 %v2762_v14, %s4009_s21 }
 0x9c8   :  { %v3823_v15 = vpop.f32.mrf.mxu1 }
 0x9ca   :  { %v2838_v17 = vpop.f32.mrf.mxu0 }
 0x9cb   :  { %2958 = vrot.lane.b32.xlu1 %v2838_v17, %s4009_s21 }
 0x9cc   :  { %v3828_v18 = vpop.f32.mrf.mxu0 }
 0x9ce   :  { %v2914_v19 = vpop.f32.mrf.mxu1 }
 0x9cf   :  { %2960 = vrot.lane.b32.xlu0 %v2914_v19, %s4009_s21 }
 0x9d0   :  { %v3833_v20 = vpop.f32.mrf.mxu1 }
 0xa35   :  { %v2955_v37 = vpop.permute.xlu1 %2954 }
 0xa36   :  { %v2976_v38 = vsel %vm2975_vm4, %v2971_v25, %v2955_v37 }
 0xa37   :  { %3842 = vmatprep.mubr.msk.f32.mxu0 %vm66_vm0, %v2976_v38 }
 0xa39   :  { %v2957_v40 = vpop.permute.xlu0 %2956 }
 0xa3a   :  { %v2977_v41 = vsel %vm2975_vm4, %v2972_v39, %v2957_v40 }
 0xa3b   :  { %3843 = vmatmul.mubr.msk.f32.vlgmr.msra.gmra.mxu0 %vm66_vm0, %v2977_v41 }
 0xa3d   :  { %v2959_v45 = vpop.permute.xlu1 %2958 }
 0xa3e   :  { %v2978_v47 = vsel %vm2975_vm4, %v2973_v43, %v2959_v45 }
 0xa3f   :  { %3845 = vmatprep.mubr.msk.f32.mxu0 %vm66_vm0, %v2978_v47  ;;  %v3528_v47 = vld [vmem:[%s4535_s4 + $0x4] ss:$0 sm:$0xff] }
 0xa41   :  { %v2961_v50 = vpop.permute.xlu0 %2960 }
 0xa42   :  { %v2979_v55 = vsel %vm2975_vm4, %v2974_v49, %v2961_v50 }
 0xa43   :  { %3846 = vmatmul.mubr.msk.f32.gmra.mxu0 %vm66_vm0, %v2979_v55  ;;  %v3529_v55 = vld [vmem:[%s4535_s4 + $0x5] ss:$0 sm:$0xff] }
 0xafb   :  { %v3844_v56 = vpop.f32.mrf.mxu0 }
 0xafc   :  { %v3068_v57 = vadd.f32 %v3844_v56, %v3523_v46 }
 0xafd   :  { %v3062_v58 = vpop.f32.mrf.mxu0 }
 0xafe   :  { %v3063_v51 = vadd.f32 %v3523_v46, %v3062_v58  ;;  %v3082_v48 = vadd.f32 %v3971_v59, %v3068_v57 }
 0xb00   :  { %v3088_v60 = vsel %vm66_vm0, %v3082_v48, 0.0  ;;  %v3081_v61 = vadd.f32 %v3972_v29, %v3063_v51 }
 0xb01   :  { %3089 = vadd.xlane.f32.xlu0 %v3088_v60 }
 0xb02   :  { %v3085_v32 = vsel %vm66_vm0, %v3081_v61, 0.0 }
 0xb03   :  { %3086 = vadd.xlane.f32.xlu1 %v3085_v32  ;;  %v3847_v33 = vpop.f32.mrf.mxu0 }
 0xb04   :  { %v3078_v53 = vadd.f32 %v3847_v33, %v3523_v46  ;;  %v3463_v33 = vld [vmem:[%s4533_s2 + $0x78] sm:$0xff] }
 0xb05   :  { %v3072_v62 = vpop.f32.mrf.mxu0  ;;  %3862 = vmatprep.subr.mxu0 %v3463_v33 }
 0xb06   :  { %v3073_v54 = vadd.f32 %v3523_v46, %v3072_v62  ;;  %v3084_v34 = vadd.f32 %v3974_v1, %v3078_v53  ;;  %3863 = vmatpush3.msra.mxu0 %v3463_v33  ;;  %v3462_v62 = vld [vmem:[%s4533_s2 + $0x70] sm:$0xff]  ;;  %v3461_v53 = vld [vmem:[%s4533_s2 + $0x68] sm:$0xff] }
 0xb07   :  { %3864 = vmatprep.subr.mxu0 %v3462_v62 }
 0xb08   :  { %v3083_v63 = vadd.f32 %v3973_v52, %v3073_v54  ;;  %v3094_v0 = vsel %vm66_vm0, %v3084_v34, 0.0  ;;  %3865 = vmatpush3.msra.mxu0 %v3462_v62  ;;  %v3460_v54 = vld [vmem:[%s4533_s2 + $0x60] sm:$0xff] }
 0xb09   :  { %3866 = vmatprep.subr.mxu0 %v3461_v53  ;;  %v3530_v52 = vld [vmem:[%s4535_s4 + $0x6] ss:$0 sm:$0xff] }
 0xb0a   :  { %v3091_v31 = vsel %vm66_vm0, %v3083_v63, 0.0  ;;  %3867 = vmatpush3.msra.mxu0 %v3461_v53 }
 0xb0b   :  { %3092 = vadd.xlane.f32.xlu0 %v3091_v31  ;;  %3868 = vmatprep.subr.mxu0 %v3460_v54 }
 0xb0c   :  { %3869 = vmatpush3.msra.mxu0 %v3460_v54  ;;  %v3540_v54 = vld [vmem:[%s4535_s4 + $0x8] ss:$0 sm:$0xff] }
 0xb0f   :  { %3095 = vadd.xlane.f32.xlu0 %v3094_v0 }
 0xb8a   :  { %v3090_v3 = vpop.xlane.xlu0 %3089 }
 0xb8b   :  { %v3099_v5 = vmul.f32 0.03125, %v3090_v3 }
 0xb8c   :  { %v3087_v2 = vpop.xlane.xlu1 %3086 }
 0xb8d   :  { %v3103_v4 = vsub.f32 %v3082_v48, %v3099_v5  ;;  %v3098_v6 = vmul.f32 0.03125, %v3087_v2 }
 0xb8f   :  { %v3102_v7 = vsub.f32 %v3081_v61, %v3098_v6  ;;  %v3107_v8 = vmul.f32 %v3103_v4, %v3103_v4 }
 0xb91   :  { %v3113_v9 = vsel %vm66_vm0, %v3107_v8, 0.0  ;;  %v3106_v10 = vmul.f32 %v3102_v7, %v3102_v7 }
 0xb92   :  { %3114 = vadd.xlane.f32.xlu0 %v3113_v9  ;;  %v3535_v9 = vld [vmem:[%s4535_s4 + $0x7] ss:$0 sm:$0xff] }
 0xb93   :  { %v3110_v16 = vsel %vm66_vm0, %v3106_v10, 0.0 }
 0xb94   :  { %3111 = vadd.xlane.f32.xlu1 %v3110_v16  ;;  %v3093_v11 = vpop.xlane.xlu0 %3092 }
 0xb95   :  { %v3100_v12 = vmul.f32 0.03125, %v3093_v11 }
 0xb97   :  { %v3104_v13 = vsub.f32 %v3083_v63, %v3100_v12 }
 0xb98   :  { %v3096_v14 = vpop.xlane.xlu0 %3095 }
 0xb99   :  { %v3101_v15 = vmul.f32 0.03125, %v3096_v14  ;;  %v3108_v17 = vmul.f32 %v3104_v13, %v3104_v13 }
 0xb9b   :  { %v3105_v18 = vsub.f32 %v3084_v34, %v3101_v15  ;;  %v3116_v19 = vsel %vm66_vm0, %v3108_v17, 0.0 }
 0xb9c   :  { %3117 = vadd.xlane.f32.xlu1 %v3116_v19 }
 0xb9d   :  { %v3109_v20 = vmul.f32 %v3105_v18, %v3105_v18 }
 0xb9f   :  { %v3119_v22 = vsel %vm66_vm0, %v3109_v20, 0.0 }
 0xba0   :  { %3120 = vadd.xlane.f32.xlu0 %v3119_v22 }
 0xc1b   :  { %v3115_v30 = vpop.xlane.xlu0 %3114 }
 0xc1c   :  { %v3123_v21 = vmul.f32 0.03125, %v3115_v30 }
 0xc1d   :  { %v3112_v35 = vpop.xlane.xlu1 %3111 }
 0xc1e   :  { %v3127_v25 = vadd.f32 1e-05, %v3123_v21  ;;  %v3122_v36 = vmul.f32 0.03125, %v3112_v35 }
 0xc20   :  { %3955 = vrsqrt.f32 %v3127_v25  ;;  %v3126_v37 = vadd.f32 1e-05, %v3122_v36 }
 0xc22   :  { %3957 = vrsqrt.f32 %v3126_v37 }
 0xc25   :  { %v3118_v38 = vpop.xlane.xlu1 %3117 }
 0xc26   :  { %v3124_v28 = vmul.f32 0.03125, %v3118_v38 }
 0xc28   :  { %v3128_v39 = vadd.f32 1e-05, %v3124_v28 }
 0xc29   :  { %v3121_v40 = vpop.xlane.xlu0 %3120 }
 0xc2a   :  { %3959 = vrsqrt.f32 %v3128_v39  ;;  %v3125_v41 = vmul.f32 0.03125, %v3121_v40 }
 0xc2c   :  { %v3129_v42 = vadd.f32 1e-05, %v3125_v41 }
 0xc2d   :  { %v3956_v43 = vpop.eup %3955 }
 0xc2e   :  { %v3135_v45 = vmul.f32 %v3956_v43, %v3103_v4  ;;  %3961 = vrsqrt.f32 %v3129_v42 }
 0xc2f   :  { %v3958_v44 = vpop.eup %3957 }
 0xc30   :  { %v3134_v49 = vmul.f32 %v3958_v44, %v3102_v7  ;;  %v3143_v50 = vmul.f32 %v3528_v47, %v3135_v45 }
 0xc32   :  { %v3142_v46 = vmul.f32 %v3528_v47, %v3134_v49  ;;  %v3151_v57 = vadd.f32 %v3529_v55, %v3143_v50 }
 0xc34   :  { %v3150_v56 = vadd.f32 %v3529_v55, %v3142_v46 }
 0xc36   :  { %3856 = vmatprep.mubr.msk.f32.mxu1 %vm66_vm0, %v3150_v56 }
 0xc37   :  { %v3960_v58 = vpop.eup %3959  ;;  %3857 = vmatmul.mubr.msk.f32.vlgmr.msra.gmra.mxu1 %vm66_vm0, %v3151_v57 }
 0xc38   :  { %v3136_v51 = vmul.f32 %v3960_v58, %v3104_v13 }
 0xc3a   :  { %v3144_v59 = vmul.f32 %v3528_v47, %v3136_v51 }
 0xc3b   :  { %v3962_v48 = vpop.eup %3961 }
 0xc3c   :  { %v3152_v60 = vadd.f32 %v3529_v55, %v3144_v59  ;;  %v3137_v29 = vmul.f32 %v3962_v48, %v3105_v18 }
 0xc3e   :  { %3859 = vmatprep.mubr.msk.f32.mxu1 %vm66_vm0, %v3152_v60  ;;  %v3145_v61 = vmul.f32 %v3528_v47, %v3137_v29 }
 0xc40   :  { %v3153_v32 = vadd.f32 %v3529_v55, %v3145_v61 }
 0xc42   :  { %3860 = vmatmul.mubr.msk.f32.gmra.mxu1 %vm66_vm0, %v3153_v32 }
 0xcf7   :  { %v3858_v63 = vpop.f32.mrf.mxu1 }
 0xcf8   :  { %v3242_v31 = vadd.f32 %v3858_v63, %v3530_v52 }
 0xcf9   :  { %v3236_v1 = vpop.f32.mrf.mxu1 }
 0xcfa   :  { %v3237_v34 = vadd.f32 %v3530_v52, %v3236_v1  ;;  %v3256_v3 = vmax.f32 %v3242_v31, 0.0  ;;  %v3541_v31 = vld [vmem:[%s4535_s4 + $0x9] ss:$0 sm:$0xff]  ;;  %s3975_s4 = scalar_lea.vmem %s3442_s6, 512 }
 0xcfb   :  { %p3976_p0 = scmp.ne.s32.totalorder %s3442_s6, %s3975_s4  ;;  %p3981_p2 = scmp.lt.s32.totalorder %s3975_s4, %s3975_s4 }
 0xcfc   :  { %v3255_v0 = vmax.f32 %v3237_v34, 0.0 }
 0xcfd   :  { %p3982_p3 = por %p3981_p2, %p3980_p1 }
 0xcfe   :  { %3870 = vmatprep.mubr.msk.f32.mxu0 %vm66_vm0, %v3255_v0 }
 0xcff   :  { %3871 = vmatmul.mubr.msk.f32.vlgmr.msra.gmra.mxu0 %vm66_vm0, %v3256_v3  ;;  %p3983_p4 = pnand %p3982_p3, %p3976_p0 }
 0xd02   :  { %v3861_v5 = vpop.f32.mrf.mxu1 }
 0xd03   :  { %v3252_v2 = vadd.f32 %v3861_v5, %v3530_v52 }
 0xd04   :  { %v3246_v4 = vpop.f32.mrf.mxu1 }
 0xd05   :  { %v3247_v6 = vadd.f32 %v3530_v52, %v3246_v4  ;;  %v3258_v8 = vmax.f32 %v3252_v2, 0.0 }
 0xd07   :  { %v3257_v7 = vmax.f32 %v3247_v6, 0.0 }
 0xd09   :  { %3873 = vmatprep.mubr.msk.f32.mxu0 %vm66_vm0, %v3257_v7 }
 0xd0a   :  { %3874 = vmatmul.mubr.msk.f32.gmra.mxu0 %vm66_vm0, %v3258_v8 }
 0xdbf   :  { %v3872_v10 = vpop.f32.mrf.mxu0 }
 0xdc0   :  { %v3347_v16 = vadd.f32 %v3872_v10, %v3535_v9 }
 0xdc1   :  { %v3341_v11 = vpop.f32.mrf.mxu0 }
 0xdc2   :  { %v3342_v12 = vadd.f32 %v3535_v9, %v3341_v11  ;;  %v3361_v13 = vadd.f32 %v3347_v16, %v3151_v57 }
 0xdc4   :  { %v3367_v14 = vsel %vm66_vm0, %v3361_v13, 0.0  ;;  %v3360_v15 = vadd.f32 %v3342_v12, %v3150_v56 }
 0xdc5   :  { %3368 = vadd.xlane.f32.xlu0 %v3367_v14 }
 0xdc6   :  { %v3364_v17 = vsel %vm66_vm0, %v3360_v15, 0.0 }
 0xdc7   :  { %3365 = vadd.xlane.f32.xlu1 %v3364_v17 }
 0xdca   :  { %v3875_v18 = vpop.f32.mrf.mxu0 }
 0xdcb   :  { %v3357_v19 = vadd.f32 %v3875_v18, %v3535_v9 }
 0xdcc   :  { %v3351_v20 = vpop.f32.mrf.mxu0 }
 0xdcd   :  { %v3352_v22 = vadd.f32 %v3535_v9, %v3351_v20  ;;  %v3363_v23 = vadd.f32 %v3357_v19, %v3153_v32 }
 0xdcf   :  { %v3373_v24 = vsel %vm66_vm0, %v3363_v23, 0.0  ;;  %v3362_v26 = vadd.f32 %v3352_v22, %v3152_v60 }
 0xdd0   :  { %3374 = vadd.xlane.f32.xlu0 %v3373_v24 }
 0xdd1   :  { %v3370_v27 = vsel %vm66_vm0, %v3362_v26, 0.0 }
 0xdd2   :  { %3371 = vadd.xlane.f32.xlu1 %v3370_v27 }
 0xe4e   :  { %v3369_v30 = vpop.xlane.xlu0 %3368 }
 0xe4f   :  { %v3377_v21 = vmul.f32 0.03125, %v3369_v30 }
 0xe50   :  { %v3366_v35 = vpop.xlane.xlu1 %3365 }
 0xe51   :  { %v3381_v25 = vsub.f32 %v3361_v13, %v3377_v21  ;;  %v3376_v36 = vmul.f32 0.03125, %v3366_v35 }
 0xe53   :  { %v3380_v37 = vsub.f32 %v3360_v15, %v3376_v36  ;;  %v3385_v38 = vmul.f32 %v3381_v25, %v3381_v25 }
 0xe55   :  { %v3391_v28 = vsel %vm66_vm0, %v3385_v38, 0.0  ;;  %v3384_v39 = vmul.f32 %v3380_v37, %v3380_v37 }
 0xe56   :  { %3392 = vadd.xlane.f32.xlu0 %v3391_v28 }
 0xe57   :  { %v3388_v40 = vsel %vm66_vm0, %v3384_v39, 0.0 }
 0xe58   :  { %3389 = vadd.xlane.f32.xlu1 %v3388_v40 }
 0xe59   :  { %v3375_v41 = vpop.xlane.xlu0 %3374 }
 0xe5a   :  { %v3379_v42 = vmul.f32 0.03125, %v3375_v41 }
 0xe5b   :  { %v3372_v43 = vpop.xlane.xlu1 %3371 }
 0xe5c   :  { %v3383_v45 = vsub.f32 %v3363_v23, %v3379_v42  ;;  %v3378_v47 = vmul.f32 0.03125, %v3372_v43 }
 0xe5e   :  { %v3382_v44 = vsub.f32 %v3362_v26, %v3378_v47  ;;  %v3387_v49 = vmul.f32 %v3383_v45, %v3383_v45 }
 0xe60   :  { %v3397_v50 = vsel %vm66_vm0, %v3387_v49, 0.0  ;;  %v3386_v55 = vmul.f32 %v3382_v44, %v3382_v44 }
 0xe61   :  { %3398 = vadd.xlane.f32.xlu0 %v3397_v50 }
 0xe62   :  { %v3394_v46 = vsel %vm66_vm0, %v3386_v55, 0.0 }
 0xe63   :  { %3395 = vadd.xlane.f32.xlu1 %v3394_v46 }
 0xedf   :  { %v3393_v56 = vpop.xlane.xlu0 %3392 }
 0xee0   :  { %v3401_v57 = vmul.f32 0.03125, %v3393_v56 }
 0xee1   :  { %v3390_v58 = vpop.xlane.xlu1 %3389 }
 0xee2   :  { %v3405_v51 = vadd.f32 1e-05, %v3401_v57  ;;  %v3400_v59 = vmul.f32 0.03125, %v3390_v58 }
 0xee4   :  { %3963 = vrsqrt.f32 %v3405_v51  ;;  %v3404_v48 = vadd.f32 1e-05, %v3400_v59 }
 0xee6   :  { %3965 = vrsqrt.f32 %v3404_v48 }
 0xeea   :  { %v3399_v60 = vpop.xlane.xlu0 %3398 }
 0xeeb   :  { %v3403_v29 = vmul.f32 0.03125, %v3399_v60 }
 0xeec   :  { %v3396_v61 = vpop.xlane.xlu1 %3395 }
 0xeed   :  { %v3407_v32 = vadd.f32 1e-05, %v3403_v29  ;;  %v3402_v33 = vmul.f32 0.03125, %v3396_v61 }
 0xeef   :  { %3967 = vrsqrt.f32 %v3407_v32  ;;  %v3406_v62 = vadd.f32 1e-05, %v3402_v33 }
 0xef1   :  { %v3964_v53 = vpop.eup %3963  ;;  %3969 = vrsqrt.f32 %v3406_v62 }
 0xef2   :  { %v3413_v52 = vmul.f32 %v3964_v53, %v3381_v25 }
 0xef3   :  { %v3966_v63 = vpop.eup %3965 }
 0xef4   :  { %v3421_v1 = vmul.f32 %v3540_v54, %v3413_v52  ;;  %v3412_v34 = vmul.f32 %v3966_v63, %v3380_v37 }
 0xef6   :  { %v3420_v0 = vmul.f32 %v3540_v54, %v3412_v34  ;;  %v3429_v3 = vadd.f32 %v3541_v31, %v3421_v1 }
 0xef8   :  { %v3428_v5 = vadd.f32 %v3541_v31, %v3420_v0  ;;  %3433 = vst.msk [vmem:[#allocation2 + $0x8] sm:$0xff] %vm66_vm0, %v3429_v3 }
 0xefa   :  { %3432 = vst.msk [vmem:[#allocation2] sm:$0xff] %vm66_vm0, %v3428_v5 }
 0xefc   :  { %v3968_v2 = vpop.eup %3967 }
 0xefd   :  { %v3415_v4 = vmul.f32 %v3968_v2, %v3383_v45 }
 0xefe   :  { %v3970_v6 = vpop.eup %3969 }
 0xeff   :  { %v3423_v7 = vmul.f32 %v3540_v54, %v3415_v4  ;;  %v3414_v8 = vmul.f32 %v3970_v6, %v3382_v44 }
 0xf01   :  { %v3422_v9 = vmul.f32 %v3540_v54, %v3414_v8  ;;  %v3431_v10 = vadd.f32 %v3541_v31, %v3423_v7 }
 0xf03   :  { %v3430_v16 = vadd.f32 %v3541_v31, %v3422_v9  ;;  %3435 = vst.msk [vmem:[#allocation2 + $0x18] sm:$0xff] %vm66_vm0, %v3431_v10 }
 0xf05   :  { %3434 = vst.msk [vmem:[#allocation2 + $0x10] sm:$0xff] %vm66_vm0, %v3430_v16 }
 0xf06   :  { %3986 = shalt.err (!%p3983_p4)
}
 0xf07   :  { %s4011_s7 = smov 128  }
 0xf08   :  { %3447 = dma.vmem_to_hbm [thread:$0]  %s3442_s6, 512, %s4536_s5, [#allocation3], %s4011_s7, %s4011_s7, %s4007_s12  }
 0xf09   :  { %3995 = dma.done.wait [#allocation3], 512  }
 0xf0a   :  { %3996 = vsyncadd [#allocation3], 4294966784 }
 0xf0b   :  { %3451 = vsyncpa [#allocation3], 1 }

</bundles_post_ra>
